<compile_context>
chip_gen: v7x
topology: tpu7x:2x2x1
jax: 0.10.0
libtpu: 0.0.40
codegen_flags: <defaults>
</compile_context>

<pallas_src>
import functools
import math

import jax
import jax.numpy as jnp
from jax.experimental import pallas as pl
from jax.experimental.pallas import tpu as pltpu


_NEG_BIG = -1e30  # finite "minus infinity": exp(x - m) underflows to 0, no NaNs


def _round_up(n: int, m: int) -> int:
    return ((n + m - 1) // m) * m


def _vmem_limit_bytes() -> int:
    """Generation-aware scoped-VMEM limit (~3/4 of physical VMEM per core)."""
    try:
        cap = int(pltpu.get_tpu_info().vmem_capacity_bytes)
    except Exception:  # pragma: no cover - fall back to the smallest (v7x) size
        cap = 64 * 1024 * 1024
    return max((cap * 3) // 4, 32 * 1024 * 1024)


def _pick_contract_tile(dim: int, target: int = 512) -> int:
    """Largest multiple of 128 <= target that divides dim (or the full dim)."""
    if dim <= target:
        return dim
    t = (target // 128) * 128
    while t >= 128:
        if dim % t == 0:
            return t
        t -= 128
    return dim


# Rough per-kernel VMEM estimates (double-buffered blocks + f32 scratch +
# in-kernel f32 temporaries) used to size the sequence row tile.
def _k1_vmem(t, tdk, Hq, Hk, d_head, isize):
    qkv_w = Hq + 2 * Hk
    stream = 2 * (t * tdk + tdk * qkv_w + tdk) * isize   # x, Wq/Wk/Wv, w_norm
    rope = 4 * t * d_head * isize                        # cos/sin blocks
    outs = 2 * t * qkv_w * isize                         # q/k/v output blocks
    scratch = t * (qkv_w + 1) * 4                        # f32 accumulators + ssq
    temps = 3 * t * Hq * 4                               # f32 RoPE epilogue temps
    return stream + rope + outs + scratch + temps


def _k2_vmem(t, Hq, Hk, n_heads, isize):
    stream = 2 * (t * Hq + 2 * t * Hk) * isize           # q, k, v blocks
    outs = 2 * t * Hq * isize
    scratch = t * Hq * 4 + 2 * n_heads * t * 4           # acc + m/l
    temps = 2 * t * t * 4 + t * Hq * isize               # scores/probs + scaled q
    return stream + outs + scratch + temps


def _k3_vmem(t, thk, Hq, d_model, isize):
    stream = 2 * (t * thk + thk * d_model + t * d_model) * isize
    outs = 2 * t * d_model * isize
    scratch = t * d_model * 4
    return stream + outs + scratch


def _pick_seq_tile(S, fits):
    s8 = _round_up(S, 8)
    if s8 <= 512 and fits(s8):
        return s8
    t = 512
    while t > 8 and (t > s8 or not fits(t)):
        t //= 2
    return max(t, 8)


def _rope_rotate(x, cos, sin_signed):
    """x * cos + rope_swap(x) * sin with interleaved pairs along the lane axis.

    The pair sign is pre-folded into `sin_signed` (even lanes carry -sin), so
    only two XLU lane rolls and one parity select are needed.  d_head is even,
    so pairs never cross a head boundary and the circular wrap lanes are
    deselected.
    """
    w = x.shape[-1]
    nxt = pltpu.roll(x, shift=w - 1, axis=1)   # nxt[j] = x[(j + 1) % w]
    prv = pltpu.roll(x, shift=1, axis=1)       # prv[j] = x[(j - 1) % w]
    lane = jax.lax.broadcasted_iota(jnp.int32, x.shape, 1)
    swapped = jnp.where(lane % 2 == 0, nxt, prv)
    return x * cos + swapped * sin_signed


# --------------------------- K1: norm + QKV + RoPE ---------------------------
def _norm_qkv_rope_kernel(eps, d_model, n_heads, n_kv_heads,
                          x_ref, wn_ref, wq_ref, wk_ref, wv_ref,
                          cos_ref, sin_ref,
                          q_ref, k_ref, v_ref,
                          qacc, kacc, vacc, ssq):
    kstep = pl.program_id(1)

    @pl.when(kstep == 0)
    def _init():
        qacc[...] = jnp.zeros_like(qacc)
        kacc[...] = jnp.zeros_like(kacc)
        vacc[...] = jnp.zeros_like(vacc)
        ssq[...] = jnp.zeros_like(ssq)

    x = x_ref[...].astype(jnp.float32)                      # (tile, dk_tile)
    ssq[...] += jnp.sum(x * x, axis=-1, keepdims=True)
    # RMSNorm scale is per-row, so it commutes with the matmul: apply the
    # weight now, the rsqrt(mean(x^2)+eps) factor after the full contraction.
    xw = (x * wn_ref[...].astype(jnp.float32)).astype(wq_ref.dtype)
    qacc[...] += jnp.dot(xw, wq_ref[...], preferred_element_type=jnp.float32)
    kacc[...] += jnp.dot(xw, wk_ref[...], preferred_element_type=jnp.float32)
    vacc[...] += jnp.dot(xw, wv_ref[...], preferred_element_type=jnp.float32)

    @pl.when(kstep == pl.num_programs(1) - 1)
    def _finalize():
        inv = jax.lax.rsqrt(ssq[...] * (1.0 / d_model) + eps)   # (tile, 1)
        cos = cos_ref[...].astype(jnp.float32)                  # (tile, d_head)
        sin = sin_ref[...].astype(jnp.float32)
        cos_q = jnp.tile(cos, (1, n_heads))
        sin_q = jnp.tile(sin, (1, n_heads))
        cos_k = jnp.tile(cos, (1, n_kv_heads))
        sin_k = jnp.tile(sin, (1, n_kv_heads))
        q = _rope_rotate(qacc[...] * inv, cos_q, sin_q)
        k = _rope_rotate(kacc[...] * inv, cos_k, sin_k)
        q_ref[...] = q.astype(q_ref.dtype)
        k_ref[...] = k.astype(k_ref.dtype)
        v_ref[...] = (vacc[...] * inv).astype(v_ref.dtype)


# ------------------- K2: causal flash attention (all heads) ------------------
def _flash_attn_kernel(scale, n_heads, reps, d_head,
                       q_ref, k_ref, v_ref, o_ref,
                       m_ref, l_ref, acc_ref):
    qi = pl.program_id(0)
    ki = pl.program_id(1)
    n_k = pl.num_programs(1)
    tq = q_ref.shape[0]
    tk = k_ref.shape[0]

    @pl.when(ki == 0)
    def _init():
        m_ref[...] = jnp.full_like(m_ref, _NEG_BIG)
        l_ref[...] = jnp.zeros_like(l_ref)
        acc_ref[...] = jnp.zeros_like(acc_ref)

    # Causal block skipping: with tq == tk, a kv tile contributes iff ki <= qi
    # (its fetch is also elided via the clamped index_map in the wrapper).
    @pl.when(ki <= qi)
    def _compute():
        row = qi * tq + jax.lax.broadcasted_iota(jnp.int32, (tq, tk), 0)
        col = ki * tk + jax.lax.broadcasted_iota(jnp.int32, (tq, tk), 1)
        causal = col <= row

        # Fold 1/sqrt(d_head) into q once; keep MXU operands in the model dtype.
        q_all = (q_ref[...].astype(jnp.float32) * scale).astype(q_ref.dtype)
        k_all = k_ref[...]
        v_all = v_ref[...]

        for h in range(n_heads):
            g = h // reps                       # GQA: q head -> kv head
            qs = slice(h * d_head, (h + 1) * d_head)
            gs = slice(g * d_head, (g + 1) * d_head)
            s = jax.lax.dot_general(q_all[:, qs], k_all[:, gs],
                                    (((1,), (1,)), ((), ())),
                                    preferred_element_type=jnp.float32)
            s = jnp.where(causal, s, _NEG_BIG)
            m_prev = m_ref[h]
            l_prev = l_ref[h]
            m_new = jnp.maximum(m_prev, jnp.max(s, axis=-1, keepdims=True))
            alpha = jnp.exp(m_prev - m_new)
            p = jnp.exp(s - m_new)
            l_ref[h] = alpha * l_prev + jnp.sum(p, axis=-1, keepdims=True)
            m_ref[h] = m_new
            pv = jnp.dot(p.astype(v_all.dtype), v_all[:, gs],
                         preferred_element_type=jnp.float32)
            acc_ref[:, qs] = alpha * acc_ref[:, qs] + pv

    @pl.when(ki == n_k - 1)
    def _finalize():
        pieces = []
        for h in range(n_heads):
            inv = pl.reciprocal(l_ref[h], approx=True)
            pieces.append(acc_ref[:, h * d_head:(h + 1) * d_head] * inv)
        # One lane-dense (tile, Hq) store (no masked per-head partial stores).
        o_ref[...] = jnp.concatenate(pieces, axis=-1).astype(o_ref.dtype)


# --------------------------- K3: output proj + residual ----------------------
def _out_proj_residual_kernel(a_ref, wo_ref, res_ref, o_ref, acc_ref):
    kstep = pl.program_id(1)

    @pl.when(kstep == 0)
    def _init():
        acc_ref[...] = res_ref[...].astype(jnp.float32)

    acc_ref[...] += jnp.dot(a_ref[...], wo_ref[...],
                            preferred_element_type=jnp.float32)

    @pl.when(kstep == pl.num_programs(1) - 1)
    def _finalize():
        o_ref[...] = acc_ref[...].astype(o_ref.dtype)


# ---------------------------------- wrapper ----------------------------------
def llama_attention(x, r_cos, r_sin, norm_weight, wq, wk, wv, wo, *,
                    eps, n_heads, n_kv_heads, d_head,
                    seq_tile=None, dk_tile=None, hq_tile=None):
    """Forward pass of LlamaAttention with a causal mask generated in-kernel.

    Linear weights are stored as (in_features, out_features), i.e. the
    transpose of the PyTorch nn.Linear layout.  r_cos / r_sin are (S, d_head).
    """
    # TODO(synk): arbitrary (non-causal) additive masks would be streamed as
    # (tq, tk) blocks into K2; the causal mask is generated in-kernel here.
    S, d_model = x.shape
    Hq = n_heads * d_head
    Hk = n_kv_heads * d_head
    assert n_heads % n_kv_heads == 0 and d_head % 2 == 0
    assert wq.shape == (d_model, Hq) and wk.shape == (d_model, Hk)
    assert wv.shape == (d_model, Hk) and wo.shape == (Hq, d_model)
    assert r_cos.shape == (S, d_head) and r_sin.shape == (S, d_head)
    reps = n_heads // n_kv_heads
    dtype = x.dtype
    isize = jnp.dtype(dtype).itemsize

    vmem_limit = _vmem_limit_bytes()
    budget = (vmem_limit * 4) // 5

    tdk = dk_tile or _pick_contract_tile(d_model)
    thk = hq_tile or _pick_contract_tile(Hq)
    assert d_model % tdk == 0 and (tdk % 128 == 0 or tdk == d_model)
    assert Hq % thk == 0 and (thk % 128 == 0 or thk == Hq)

    def fits(t):
        return max(_k1_vmem(t, tdk, Hq, Hk, d_head, isize),
                   _k2_vmem(t, Hq, Hk, n_heads, isize),
                   _k3_vmem(t, thk, Hq, d_model, isize)) <= budget

    t_seq = seq_tile or _pick_seq_tile(S, fits)
    assert t_seq % 8 == 0 and t_seq > 0
    s_pad = _round_up(S, t_seq)

    # Padding only triggers when S is not a multiple of the row tile (rare in
    # practice); the common path does no extra HBM copies.
    def pad_rows(a):
        return a if s_pad == S else jnp.pad(a, ((0, s_pad - S), (0, 0)))

    x_pad = pad_rows(x)
    wn2d = norm_weight.reshape(1, d_model)
    # Pre-fold the RoPE pair sign into the sin table (even lanes carry -sin).
    lane = jnp.arange(d_head)
    sin_signed = jnp.where((lane % 2) == 0, -r_sin, r_sin)
    cos_t = pad_rows(r_cos.astype(dtype))
    sin_t = pad_rows(sin_signed.astype(dtype))

    n_row = s_pad // t_seq
    n_dk = d_model // tdk
    n_hq = Hq // thk

    compiler_params = pltpu.CompilerParams(
        dimension_semantics=("parallel", "arbitrary"),
        vmem_limit_bytes=vmem_limit)

    # ---- K1: fused RMSNorm + QKV projection + RoPE (d_model K-tiled) --------
    q2, k2, v2 = pl.pallas_call(
        functools.partial(_norm_qkv_rope_kernel, float(eps), d_model,
                          n_heads, n_kv_heads),
        out_shape=(jax.ShapeDtypeStruct((s_pad, Hq), dtype),
                   jax.ShapeDtypeStruct((s_pad, Hk), dtype),
                   jax.ShapeDtypeStruct((s_pad, Hk), dtype)),
        grid_spec=pltpu.PrefetchScalarGridSpec(
            num_scalar_prefetch=0,
            grid=(n_row, n_dk),
            in_specs=[
                pl.BlockSpec((t_seq, tdk), lambda i, k: (i, k)),
                pl.BlockSpec((1, tdk), lambda i, k: (0, k)),
                pl.BlockSpec((tdk, Hq), lambda i, k: (k, 0)),
                pl.BlockSpec((tdk, Hk), lambda i, k: (k, 0)),
                pl.BlockSpec((tdk, Hk), lambda i, k: (k, 0)),
                pl.BlockSpec((t_seq, d_head), lambda i, k: (i, 0)),
                pl.BlockSpec((t_seq, d_head), lambda i, k: (i, 0)),
            ],
            out_specs=(
                pl.BlockSpec((t_seq, Hq), lambda i, k: (i, 0)),
                pl.BlockSpec((t_seq, Hk), lambda i, k: (i, 0)),
                pl.BlockSpec((t_seq, Hk), lambda i, k: (i, 0)),
            ),
            scratch_shapes=[
                pltpu.VMEM((t_seq, Hq), jnp.float32),
                pltpu.VMEM((t_seq, Hk), jnp.float32),
                pltpu.VMEM((t_seq, Hk), jnp.float32),
                pltpu.VMEM((t_seq, 1), jnp.float32),
            ]),
        compiler_params=compiler_params,
    )(x_pad, wn2d, wq, wk, wv, cos_t, sin_t)

    # ---- K2: causal flash GQA attention (all heads per q tile) -------------
    scale = 1.0 / math.sqrt(d_head)
    n_seq = s_pad // t_seq

    def kv_idx(qi, ki):
        # Clamp so fully-masked (skipped) kv tiles never trigger a fresh DMA.
        return (jnp.minimum(ki, qi), 0)

    attn = pl.pallas_call(
        functools.partial(_flash_attn_kernel, float(scale), n_heads, reps,
                          d_head),
        out_shape=jax.ShapeDtypeStruct((s_pad, Hq), dtype),
        grid_spec=pltpu.PrefetchScalarGridSpec(
            num_scalar_prefetch=0,
            grid=(n_seq, n_seq),
            in_specs=[
                pl.BlockSpec((t_seq, Hq), lambda qi, ki: (qi, 0)),
                pl.BlockSpec((t_seq, Hk), kv_idx),
                pl.BlockSpec((t_seq, Hk), kv_idx),
            ],
            out_specs=pl.BlockSpec((t_seq, Hq), lambda qi, ki: (qi, 0)),
            scratch_shapes=[
                pltpu.VMEM((n_heads, t_seq, 1), jnp.float32),   # m
                pltpu.VMEM((n_heads, t_seq, 1), jnp.float32),   # l
                pltpu.VMEM((t_seq, Hq), jnp.float32),           # acc
            ]),
        compiler_params=compiler_params,
    )(q2, k2, v2)

    # ---- K3: output projection + residual (Hq K-tiled) ---------------------
    out = pl.pallas_call(
        _out_proj_residual_kernel,
        out_shape=jax.ShapeDtypeStruct((s_pad, d_model), dtype),
        grid_spec=pltpu.PrefetchScalarGridSpec(
            num_scalar_prefetch=0,
            grid=(n_row, n_hq),
            in_specs=[
                pl.BlockSpec((t_seq, thk), lambda i, k: (i, k)),
                pl.BlockSpec((thk, d_model), lambda i, k: (k, 0)),
                pl.BlockSpec((t_seq, d_model), lambda i, k: (i, 0)),
            ],
            out_specs=pl.BlockSpec((t_seq, d_model), lambda i, k: (i, 0)),
            scratch_shapes=[pltpu.VMEM((t_seq, d_model), jnp.float32)]),
        compiler_params=compiler_params,
    )(attn, wo, x_pad)

    return out if s_pad == S else out[:S]


# ------------------------------- pure-JAX reference ---------------------------
def _reference_llama_attention(x, r_cos, r_sin, mask, norm_weight, wq, wk, wv,
                               wo, *, eps, n_heads, n_kv_heads, d_head):
    hp = jax.lax.Precision.HIGHEST
    S = x.shape[0]
    xn = x * jax.lax.rsqrt(jnp.mean(x * x, axis=-1, keepdims=True) + eps) * norm_weight
    q = jnp.dot(xn, wq, precision=hp)
    k = jnp.dot(xn, wk, precision=hp)
    v = jnp.dot(xn, wv, precision=hp)
    q = q.reshape(S, n_heads, d_head).transpose(1, 0, 2)
    k = k.reshape(S, n_kv_heads, d_head).transpose(1, 0, 2)
    v = v.reshape(S, n_kv_heads, d_head).transpose(1, 0, 2)
    reps = n_heads // n_kv_heads
    k = jnp.repeat(k, reps, axis=0)
    v = jnp.repeat(v, reps, axis=0)

    def rope(t):  # matches rope_rotate / rope_swap from the PyTorch module
        tp = t.reshape(t.shape[:-1] + (d_head // 2, 2))
        sw = jnp.stack([-tp[..., 1], tp[..., 0]], axis=-1).reshape(t.shape)
        return t * r_cos + sw * r_sin

    q, k = rope(q), rope(k)
    scores = jnp.einsum("hqd,hkd->hqk", q, k, precision=hp) / math.sqrt(d_head) + mask
    p = jax.nn.softmax(scores, axis=-1)
    a = jnp.einsum("hqk,hkd->hqd", p, v, precision=hp)
    a = a.transpose(1, 0, 2).reshape(S, n_heads * d_head)
    return x + jnp.dot(a, wo, precision=hp)


if __name__ == "__main__":
    # Small shapes consistent with the module; d_head=128 keeps all per-head
    # lane slices vreg-aligned, seq_tile/dk_tile/hq_tile overrides exercise the
    # flash kv loop, causal block skipping and the weight K-tiling paths.
    seq, d_model = 32, 512
    n_heads, n_kv_heads, d_head = 4, 2, 128
    eps = 1e-5
    rope_theta = 10000.0

    key = jax.random.PRNGKey(0)
    ks = jax.random.split(key, 6)
    x = jax.random.normal(ks[0], (seq, d_model), dtype=jnp.float32)
    norm_w = (jnp.ones((d_model,), jnp.float32)
              + 0.01 * jax.random.normal(ks[1], (d_model,), jnp.float32))
    # Linear weights in (in_features, out_features) layout (= PyTorch W.T).
    wq = 0.05 * jax.random.normal(ks[2], (d_model, n_heads * d_head), jnp.float32)
    wk = 0.05 * jax.random.normal(ks[3], (d_model, n_kv_heads * d_head), jnp.float32)
    wv = 0.05 * jax.random.normal(ks[4], (d_model, n_kv_heads * d_head), jnp.float32)
    wo = 0.05 * jax.random.normal(ks[5], (n_heads * d_head, d_model), jnp.float32)

    # RoPE tables (interleaved-pair convention used by rope_swap).
    pos = jnp.arange(seq, dtype=jnp.float32)[:, None]
    inv_freq = rope_theta ** (-jnp.arange(0, d_head, 2, dtype=jnp.float32) / d_head)
    ang = pos * inv_freq[None, :]
    r_cos = jnp.repeat(jnp.cos(ang), 2, axis=-1)          # (seq, d_head)
    r_sin = jnp.repeat(jnp.sin(ang), 2, axis=-1)

    y = llama_attention(x, r_cos, r_sin, norm_w, wq, wk, wv, wo,
                        eps=eps, n_heads=n_heads, n_kv_heads=n_kv_heads,
                        d_head=d_head, seq_tile=8, dk_tile=256, hq_tile=256)
    jax.block_until_ready(y)

    # Reference with an explicit causal additive mask (the module's usage).
    mask = jnp.where(jnp.tril(jnp.ones((seq, seq), dtype=bool)), 0.0, -1e9)
    mask = mask.astype(jnp.float32)
    ref = _reference_llama_attention(x, r_cos, r_sin, mask, norm_w, wq, wk, wv,
                                     wo, eps=eps, n_heads=n_heads,
                                     n_kv_heads=n_kv_heads, d_head=d_head)
    assert y.shape == x.shape
    err = float(jnp.max(jnp.abs(y - ref)))
    assert jnp.allclose(y, ref, atol=2e-2, rtol=2e-2), \
        f"mismatch vs reference (max abs err {err})"

    print("KERNEL_OK")
</pallas_src>

<mosaic_0001>
module attributes {stable_mosaic.version = 11 : i64} {
  func.func @_norm_qkv_rope_kernel(%arg0: i32, %arg1: i32, %arg2: memref<8x256xf32, #tpu.memory_space<vmem>>, %arg3: memref<1x256xf32, #tpu.memory_space<vmem>>, %arg4: memref<256x512xf32, #tpu.memory_space<vmem>>, %arg5: memref<256x256xf32, #tpu.memory_space<vmem>>, %arg6: memref<256x256xf32, #tpu.memory_space<vmem>>, %arg7: memref<8x128xf32, #tpu.memory_space<vmem>>, %arg8: memref<8x128xf32, #tpu.memory_space<vmem>>, %arg9: memref<8x512xf32, #tpu.memory_space<vmem>>, %arg10: memref<8x256xf32, #tpu.memory_space<vmem>>, %arg11: memref<8x256xf32, #tpu.memory_space<vmem>>, %arg12: memref<8x512xf32, #tpu.memory_space<vmem>>, %arg13: memref<8x256xf32, #tpu.memory_space<vmem>>, %arg14: memref<8x256xf32, #tpu.memory_space<vmem>>, %arg15: memref<8x1xf32, #tpu.memory_space<vmem>>) attributes {dimension_semantics = [#tpu.dimension_semantics<parallel>, #tpu.dimension_semantics<arbitrary>], iteration_bounds = array<i64: 4, 2>, scalar_prefetch = 0 : i64, scratch_operands = 4 : i64, tpu.core_type = #tpu.core_type<tc>, window_params = [{transform_indices = @transform_0, window_bounds = array<i64: 8, 256>}, {transform_indices = @transform_1, window_bounds = array<i64: 1, 256>}, {transform_indices = @transform_2, window_bounds = array<i64: 256, 512>}, {transform_indices = @transform_3, window_bounds = array<i64: 256, 256>}, {transform_indices = @transform_4, window_bounds = array<i64: 256, 256>}, {transform_indices = @transform_5, window_bounds = array<i64: 8, 128>}, {transform_indices = @transform_6, window_bounds = array<i64: 8, 128>}, {transform_indices = @transform_7, window_bounds = array<i64: 8, 512>}, {transform_indices = @transform_8, window_bounds = array<i64: 8, 256>}, {transform_indices = @transform_9, window_bounds = array<i64: 8, 256>}]} {
    %c0_i32 = arith.constant 0 : i32
    %0 = arith.cmpi eq, %arg1, %c0_i32 : i32
    %1 = arith.extui %0 : i1 to i32
    %c0_i32_0 = arith.constant 0 : i32
    %2 = arith.cmpi ne, %1, %c0_i32_0 : i32
    scf.if %2 {
      %cst_30 = arith.constant 0.000000e+00 : f32
      %31 = vector.broadcast %cst_30 : f32 to vector<8x512xf32>
      %c0_31 = arith.constant 0 : index
      %c0_32 = arith.constant 0 : index
      %32 = vector.load %arg12[%c0_31, %c0_32] : memref<8x512xf32, #tpu.memory_space<vmem>>, vector<8x512xf32>
      tpu.vector_store %arg12[%c0_31, %c0_32], %31 {strides = array<i32>} : memref<8x512xf32, #tpu.memory_space<vmem>>, vector<8x512xf32>,
      %cst_33 = arith.constant 0.000000e+00 : f32
      %33 = vector.broadcast %cst_33 : f32 to vector<8x256xf32>
      %c0_34 = arith.constant 0 : index
      %c0_35 = arith.constant 0 : index
      %34 = vector.load %arg13[%c0_34, %c0_35] : memref<8x256xf32, #tpu.memory_space<vmem>>, vector<8x256xf32>
      tpu.vector_store %arg13[%c0_34, %c0_35], %33 {strides = array<i32>} : memref<8x256xf32, #tpu.memory_space<vmem>>, vector<8x256xf32>,
      %cst_36 = arith.constant 0.000000e+00 : f32
      %35 = vector.broadcast %cst_36 : f32 to vector<8x256xf32>
      %c0_37 = arith.constant 0 : index
      %c0_38 = arith.constant 0 : index
      %36 = vector.load %arg14[%c0_37, %c0_38] : memref<8x256xf32, #tpu.memory_space<vmem>>, vector<8x256xf32>
      tpu.vector_store %arg14[%c0_37, %c0_38], %35 {strides = array<i32>} : memref<8x256xf32, #tpu.memory_space<vmem>>, vector<8x256xf32>,
      %cst_39 = arith.constant 0.000000e+00 : f32
      %37 = vector.broadcast %cst_39 : f32 to vector<8x1xf32>
      %c0_40 = arith.constant 0 : index
      %c0_41 = arith.constant 0 : index
      %38 = vector.load %arg15[%c0_40, %c0_41] : memref<8x1xf32, #tpu.memory_space<vmem>>, vector<8x1xf32>
      tpu.vector_store %arg15[%c0_40, %c0_41], %37 {strides = array<i32>} : memref<8x1xf32, #tpu.memory_space<vmem>>, vector<8x1xf32>,
    } else {
    }
    %c0 = arith.constant 0 : index
    %c0_1 = arith.constant 0 : index
    %3 = vector.load %arg2[%c0, %c0_1] : memref<8x256xf32, #tpu.memory_space<vmem>>, vector<8x256xf32>
    %c0_2 = arith.constant 0 : index
    %c0_3 = arith.constant 0 : index
    %4 = vector.load %arg15[%c0_2, %c0_3] : memref<8x1xf32, #tpu.memory_space<vmem>>, vector<8x1xf32>
    %5 = arith.mulf %3, %3 : vector<8x256xf32>
    %cst = arith.constant dense<0.000000e+00> : vector<8xf32>
    %6 = vector.multi_reduction <add>, %5, %cst [1] : vector<8x256xf32> to vector<8xf32>
    %7 = vector.shape_cast %6 : vector<8xf32> to vector<8x1xf32>
    %8 = arith.addf %4, %7 : vector<8x1xf32>
    %c0_4 = arith.constant 0 : index
    %c0_5 = arith.constant 0 : index
    %9 = vector.load %arg15[%c0_4, %c0_5] : memref<8x1xf32, #tpu.memory_space<vmem>>, vector<8x1xf32>
    tpu.vector_store %arg15[%c0_4, %c0_5], %8 {strides = array<i32>} : memref<8x1xf32, #tpu.memory_space<vmem>>, vector<8x1xf32>,
    %c0_6 = arith.constant 0 : index
    %c0_7 = arith.constant 0 : index
    %10 = vector.load %arg3[%c0_6, %c0_7] : memref<1x256xf32, #tpu.memory_space<vmem>>, vector<1x256xf32>
    %11 = vector.broadcast %10 : vector<1x256xf32> to vector<8x256xf32>
    %12 = arith.mulf %3, %11 : vector<8x256xf32>
    %c0_8 = arith.constant 0 : index
    %c0_9 = arith.constant 0 : index
    %13 = vector.load %arg12[%c0_8, %c0_9] : memref<8x512xf32, #tpu.memory_space<vmem>>, vector<8x512xf32>
    %c0_10 = arith.constant 0 : index
    %c0_11 = arith.constant 0 : index
    %14 = vector.load %arg4[%c0_10, %c0_11] : memref<256x512xf32, #tpu.memory_space<vmem>>, vector<256x512xf32>
    %cst_12 = arith.constant dense<0.000000e+00> : vector<8x512xf32>
    %15 = tpu.matmul %12, %14, %cst_12 {dimension_numbers = #tpu.dot_dimension_numbers<[1], [0], [0], [1], [0, 0, 1, 1], [], []>} : vector<8x256xf32>, vector<256x512xf32>, vector<8x512xf32> -> vector<8x512xf32>
    %16 = arith.addf %13, %15 : vector<8x512xf32>
    %c0_13 = arith.constant 0 : index
    %c0_14 = arith.constant 0 : index
    %17 = vector.load %arg12[%c0_13, %c0_14] : memref<8x512xf32, #tpu.memory_space<vmem>>, vector<8x512xf32>
    tpu.vector_store %arg12[%c0_13, %c0_14], %16 {strides = array<i32>} : memref<8x512xf32, #tpu.memory_space<vmem>>, vector<8x512xf32>,
    %c0_15 = arith.constant 0 : index
    %c0_16 = arith.constant 0 : index
    %18 = vector.load %arg13[%c0_15, %c0_16] : memref<8x256xf32, #tpu.memory_space<vmem>>, vector<8x256xf32>
    %c0_17 = arith.constant 0 : index
    %c0_18 = arith.constant 0 : index
    %19 = vector.load %arg5[%c0_17, %c0_18] : memref<256x256xf32, #tpu.memory_space<vmem>>, vector<256x256xf32>
    %cst_19 = arith.constant dense<0.000000e+00> : vector<8x256xf32>
    %20 = tpu.matmul %12, %19, %cst_19 {dimension_numbers = #tpu.dot_dimension_numbers<[1], [0], [0], [1], [0, 0, 1, 1], [], []>} : vector<8x256xf32>, vector<256x256xf32>, vector<8x256xf32> -> vector<8x256xf32>
    %21 = arith.addf %18, %20 : vector<8x256xf32>
    %c0_20 = arith.constant 0 : index
    %c0_21 = arith.constant 0 : index
    %22 = vector.load %arg13[%c0_20, %c0_21] : memref<8x256xf32, #tpu.memory_space<vmem>>, vector<8x256xf32>
    tpu.vector_store %arg13[%c0_20, %c0_21], %21 {strides = array<i32>} : memref<8x256xf32, #tpu.memory_space<vmem>>, vector<8x256xf32>,
    %c0_22 = arith.constant 0 : index
    %c0_23 = arith.constant 0 : index
    %23 = vector.load %arg14[%c0_22, %c0_23] : memref<8x256xf32, #tpu.memory_space<vmem>>, vector<8x256xf32>
    %c0_24 = arith.constant 0 : index
    %c0_25 = arith.constant 0 : index
    %24 = vector.load %arg6[%c0_24, %c0_25] : memref<256x256xf32, #tpu.memory_space<vmem>>, vector<256x256xf32>
    %cst_26 = arith.constant dense<0.000000e+00> : vector<8x256xf32>
    %25 = tpu.matmul %12, %24, %cst_26 {dimension_numbers = #tpu.dot_dimension_numbers<[1], [0], [0], [1], [0, 0, 1, 1], [], []>} : vector<8x256xf32>, vector<256x256xf32>, vector<8x256xf32> -> vector<8x256xf32>
    %26 = arith.addf %23, %25 : vector<8x256xf32>
    %c0_27 = arith.constant 0 : index
    %c0_28 = arith.constant 0 : index
    %27 = vector.load %arg14[%c0_27, %c0_28] : memref<8x256xf32, #tpu.memory_space<vmem>>, vector<8x256xf32>
    tpu.vector_store %arg14[%c0_27, %c0_28], %26 {strides = array<i32>} : memref<8x256xf32, #tpu.memory_space<vmem>>, vector<8x256xf32>,
    %c1_i32 = arith.constant 1 : i32
    %28 = arith.cmpi eq, %arg1, %c1_i32 : i32
    %29 = arith.extui %28 : i1 to i32
    %c0_i32_29 = arith.constant 0 : i32
    %30 = arith.cmpi ne, %29, %c0_i32_29 : i32
    scf.if %30 {
      %c0_30 = arith.constant 0 : index
      %c0_31 = arith.constant 0 : index
      %31 = vector.load %arg15[%c0_30, %c0_31] : memref<8x1xf32, #tpu.memory_space<vmem>>, vector<8x1xf32>
      %cst_32 = arith.constant 0.001953125 : f32
      %32 = vector.broadcast %cst_32 : f32 to vector<8x1xf32>
      %33 = arith.mulf %31, %32 : vector<8x1xf32>
      %cst_33 = arith.constant 9.99999974E-6 : f32
      %34 = vector.broadcast %cst_33 : f32 to vector<8x1xf32>
      %35 = arith.addf %33, %34 : vector<8x1xf32>
      %36 = math.rsqrt %35 : vector<8x1xf32>
      %c0_34 = arith.constant 0 : index
      %c0_35 = arith.constant 0 : index
      %37 = vector.load %arg7[%c0_34, %c0_35] : memref<8x128xf32, #tpu.memory_space<vmem>>, vector<8x128xf32>
      %c0_36 = arith.constant 0 : index
      %c0_37 = arith.constant 0 : index
      %38 = vector.load %arg8[%c0_36, %c0_37] : memref<8x128xf32, #tpu.memory_space<vmem>>, vector<8x128xf32>
      %39 = tpu.concatenate %37, %37, %37, %37 in 1 : vector<8x128xf32>, vector<8x128xf32>, vector<8x128xf32>, vector<8x128xf32> -> vector<8x512xf32>
      %40 = tpu.concatenate %38, %38, %38, %38 in 1 : vector<8x128xf32>, vector<8x128xf32>, vector<8x128xf32>, vector<8x128xf32> -> vector<8x512xf32>
      %41 = tpu.concatenate %37, %37 in 1 : vector<8x128xf32>, vector<8x128xf32> -> vector<8x256xf32>
      %42 = tpu.concatenate %38, %38 in 1 : vector<8x128xf32>, vector<8x128xf32> -> vector<8x256xf32>
      %c0_38 = arith.constant 0 : index
      %c0_39 = arith.constant 0 : index
      %43 = vector.load %arg12[%c0_38, %c0_39] : memref<8x512xf32, #tpu.memory_space<vmem>>, vector<8x512xf32>
      %44 = vector.broadcast %36 : vector<8x1xf32> to vector<8x512xf32>
      %45 = arith.mulf %43, %44 : vector<8x512xf32>
      %c511_i32 = arith.constant 511 : i32
      %46 = tpu.dynamic_rotate %45 by %c511_i32 dim 1 : vector<8x512xf32>, i32 -> vector<8x512xf32>
      %c1_i32_40 = arith.constant 1 : i32
      %47 = tpu.dynamic_rotate %45 by %c1_i32_40 dim 1 : vector<8x512xf32>, i32 -> vector<8x512xf32>
      %48 = tpu.iota {dimensions = array<i32: 1>} : vector<8x512xi32>
      %c2_i32 = arith.constant 2 : i32
      %c0_i32_41 = arith.constant 0 : i32
      %49 = arith.cmpi eq, %c2_i32, %c0_i32_41 : i32
      %c1_i32_42 = arith.constant 1 : i32
      %50 = arith.select %49, %c1_i32_42, %c2_i32 : i32
      %51 = vector.broadcast %50 : i32 to vector<8x512xi32>
      %52 = arith.remsi %48, %51 : vector<8x512xi32>
      %c0_i32_43 = arith.constant 0 : i32
      %53 = vector.broadcast %c0_i32_43 : i32 to vector<8x512xi32>
      %54 = arith.cmpi ne, %52, %53 : vector<8x512xi32>
      %c0_i32_44 = arith.constant 0 : i32
      %55 = vector.broadcast %c0_i32_44 : i32 to vector<8x512xi32>
      %56 = arith.cmpi slt, %52, %55 : vector<8x512xi32>
      %c0_i32_45 = arith.constant 0 : i32
      %57 = arith.cmpi slt, %50, %c0_i32_45 : i32
      %58 = vector.broadcast %57 : i1 to vector<8x512xi1>
      %59 = vector.broadcast %58 : vector<8x512xi1> to vector<8x512xi1>
      %60 = arith.xori %56, %59 : vector<8x512xi1>
      %61 = arith.andi %60, %54 : vector<8x512xi1>
      %62 = vector.broadcast %50 : i32 to vector<8x512xi32>
      %63 = arith.addi %52, %62 : vector<8x512xi32>
      %64 = arith.select %61, %63, %52 : vector<8x512xi1>, vector<8x512xi32>
      %c0_i32_46 = arith.constant 0 : i32
      %65 = vector.broadcast %c0_i32_46 : i32 to vector<8x512xi32>
      %66 = arith.cmpi eq, %64, %65 : vector<8x512xi32>
      %67 = arith.select %66, %46, %47 : vector<8x512xi1>, vector<8x512xf32>
      %68 = arith.mulf %45, %39 : vector<8x512xf32>
      %69 = arith.mulf %67, %40 : vector<8x512xf32>
      %70 = arith.addf %68, %69 : vector<8x512xf32>
      %c0_47 = arith.constant 0 : index
      %c0_48 = arith.constant 0 : index
      %71 = vector.load %arg13[%c0_47, %c0_48] : memref<8x256xf32, #tpu.memory_space<vmem>>, vector<8x256xf32>
      %72 = vector.broadcast %36 : vector<8x1xf32> to vector<8x256xf32>
      %73 = arith.mulf %71, %72 : vector<8x256xf32>
      %c255_i32 = arith.constant 255 : i32
      %74 = tpu.dynamic_rotate %73 by %c255_i32 dim 1 : vector<8x256xf32>, i32 -> vector<8x256xf32>
      %c1_i32_49 = arith.constant 1 : i32
      %75 = tpu.dynamic_rotate %73 by %c1_i32_49 dim 1 : vector<8x256xf32>, i32 -> vector<8x256xf32>
      %76 = tpu.iota {dimensions = array<i32: 1>} : vector<8x256xi32>
      %c2_i32_50 = arith.constant 2 : i32
      %c0_i32_51 = arith.constant 0 : i32
      %77 = arith.cmpi eq, %c2_i32_50, %c0_i32_51 : i32
      %c1_i32_52 = arith.constant 1 : i32
      %78 = arith.select %77, %c1_i32_52, %c2_i32_50 : i32
      %79 = vector.broadcast %78 : i32 to vector<8x256xi32>
      %80 = arith.remsi %76, %79 : vector<8x256xi32>
      %c0_i32_53 = arith.constant 0 : i32
      %81 = vector.broadcast %c0_i32_53 : i32 to vector<8x256xi32>
      %82 = arith.cmpi ne, %80, %81 : vector<8x256xi32>
      %c0_i32_54 = arith.constant 0 : i32
      %83 = vector.broadcast %c0_i32_54 : i32 to vector<8x256xi32>
      %84 = arith.cmpi slt, %80, %83 : vector<8x256xi32>
      %c0_i32_55 = arith.constant 0 : i32
      %85 = arith.cmpi slt, %78, %c0_i32_55 : i32
      %86 = vector.broadcast %85 : i1 to vector<8x256xi1>
      %87 = vector.broadcast %86 : vector<8x256xi1> to vector<8x256xi1>
      %88 = arith.xori %84, %87 : vector<8x256xi1>
      %89 = arith.andi %88, %82 : vector<8x256xi1>
      %90 = vector.broadcast %78 : i32 to vector<8x256xi32>
      %91 = arith.addi %80, %90 : vector<8x256xi32>
      %92 = arith.select %89, %91, %80 : vector<8x256xi1>, vector<8x256xi32>
      %c0_i32_56 = arith.constant 0 : i32
      %93 = vector.broadcast %c0_i32_56 : i32 to vector<8x256xi32>
      %94 = arith.cmpi eq, %92, %93 : vector<8x256xi32>
      %95 = arith.select %94, %74, %75 : vector<8x256xi1>, vector<8x256xf32>
      %96 = arith.mulf %73, %41 : vector<8x256xf32>
      %97 = arith.mulf %95, %42 : vector<8x256xf32>
      %98 = arith.addf %96, %97 : vector<8x256xf32>
      %c0_57 = arith.constant 0 : index
      %c0_58 = arith.constant 0 : index
      %99 = vector.load %arg9[%c0_57, %c0_58] : memref<8x512xf32, #tpu.memory_space<vmem>>, vector<8x512xf32>
      tpu.vector_store %arg9[%c0_57, %c0_58], %70 {strides = array<i32>} : memref<8x512xf32, #tpu.memory_space<vmem>>, vector<8x512xf32>,
      %c0_59 = arith.constant 0 : index
      %c0_60 = arith.constant 0 : index
      %100 = vector.load %arg10[%c0_59, %c0_60] : memref<8x256xf32, #tpu.memory_space<vmem>>, vector<8x256xf32>
      tpu.vector_store %arg10[%c0_59, %c0_60], %98 {strides = array<i32>} : memref<8x256xf32, #tpu.memory_space<vmem>>, vector<8x256xf32>,
      %c0_61 = arith.constant 0 : index
      %c0_62 = arith.constant 0 : index
      %101 = vector.load %arg14[%c0_61, %c0_62] : memref<8x256xf32, #tpu.memory_space<vmem>>, vector<8x256xf32>
      %102 = vector.broadcast %36 : vector<8x1xf32> to vector<8x256xf32>
      %103 = arith.mulf %101, %102 : vector<8x256xf32>
      %c0_63 = arith.constant 0 : index
      %c0_64 = arith.constant 0 : index
      %104 = vector.load %arg11[%c0_63, %c0_64] : memref<8x256xf32, #tpu.memory_space<vmem>>, vector<8x256xf32>
      tpu.vector_store %arg11[%c0_63, %c0_64], %103 {strides = array<i32>} : memref<8x256xf32, #tpu.memory_space<vmem>>, vector<8x256xf32>,
    } else {
    }
    return
  }
  func.func @transform_0(%arg0: i32, %arg1: i32) -> (i32, i32) {
    %c0_i32 = arith.constant 0 : i32
    return %arg0, %arg1 : i32, i32
  }
  func.func @transform_1(%arg0: i32, %arg1: i32) -> (i32, i32) {
    %c0_i32 = arith.constant 0 : i32
    %c0_i32_0 = arith.constant 0 : i32
    return %c0_i32, %arg1 : i32, i32
  }
  func.func @transform_2(%arg0: i32, %arg1: i32) -> (i32, i32) {
    %c0_i32 = arith.constant 0 : i32
    %c0_i32_0 = arith.constant 0 : i32
    return %arg1, %c0_i32 : i32, i32
  }
  func.func @transform_3(%arg0: i32, %arg1: i32) -> (i32, i32) {
    %c0_i32 = arith.constant 0 : i32
    %c0_i32_0 = arith.constant 0 : i32
    return %arg1, %c0_i32 : i32, i32
  }
  func.func @transform_4(%arg0: i32, %arg1: i32) -> (i32, i32) {
    %c0_i32 = arith.constant 0 : i32
    %c0_i32_0 = arith.constant 0 : i32
    return %arg1, %c0_i32 : i32, i32
  }
  func.func @transform_5(%arg0: i32, %arg1: i32) -> (i32, i32) {
    %c0_i32 = arith.constant 0 : i32
    %c0_i32_0 = arith.constant 0 : i32
    return %arg0, %c0_i32 : i32, i32
  }
  func.func @transform_6(%arg0: i32, %arg1: i32) -> (i32, i32) {
    %c0_i32 = arith.constant 0 : i32
    %c0_i32_0 = arith.constant 0 : i32
    return %arg0, %c0_i32 : i32, i32
  }
  func.func @transform_7(%arg0: i32, %arg1: i32) -> (i32, i32) {
    %c0_i32 = arith.constant 0 : i32
    %c0_i32_0 = arith.constant 0 : i32
    return %arg0, %c0_i32 : i32, i32
  }
  func.func @transform_8(%arg0: i32, %arg1: i32) -> (i32, i32) {
    %c0_i32 = arith.constant 0 : i32
    %c0_i32_0 = arith.constant 0 : i32
    return %arg0, %c0_i32 : i32, i32
  }
  func.func @transform_9(%arg0: i32, %arg1: i32) -> (i32, i32) {
    %c0_i32 = arith.constant 0 : i32
    %c0_i32_0 = arith.constant 0 : i32
    return %arg0, %c0_i32 : i32, i32
  }
}

</mosaic_0001>

<bundles_post_ra>
// kernel: tpu_custom_call.1
= control target key start
LH: loop header
LB: loop body
LE: loop exit
PB: predicated region body
PF: predicated region fallthrough
CT: control target
= control target key end

     0   :  { %s3681_s0 = inlined_call_operand.hbm [shape: f32[32,512], index: 0, kind: input, shape index: {}]   ;;  %s3682_s1 = inlined_call_operand.hbm [shape: f32[1,512], index: 1, kind: input, shape index: {}]   ;;  %s3683_s2 = inlined_call_operand.hbm [shape: f32[512,512], index: 2, kind: input, shape index: {}]   ;;  %s3684_s3 = inlined_call_operand.hbm [shape: f32[512,256], index: 3, kind: input, shape index: {}]   ;;  %s3685_s4 = inlined_call_operand.hbm [shape: f32[512,256], index: 4, kind: input, shape index: {}]   ;;  %s3686_s5 = inlined_call_operand.hbm [shape: f32[32,128], index: 5, kind: input, shape index: {}]   ;;  %s3687_s6 = inlined_call_operand.hbm [shape: f32[32,128], index: 6, kind: input, shape index: {}]   ;;  %s3688_s7 = inlined_call_operand.hbm [shape: f32[32,512], index: 7, kind: output, shape index: {0}]   ;;  %s3689_s8 = inlined_call_operand.hbm [shape: f32[32,256], index: 8, kind: output, shape index: {1}]   ;;  %s3690_s9 = inlined_call_operand.hbm [shape: f32[32,256], index: 9, kind: output, shape index: {2}]  }
   0x1   :  { %3736 = sst [smem:[#allocation50_spill]] %s3681_s0 }
   0x2   :  { %3737 = sst [smem:[#allocation51_spill]] %s3682_s1 }
   0x3   :  { %3738 = sst [smem:[#allocation52_spill]] %s3683_s2 }
   0x4   :  { %3739 = sst [smem:[#allocation53_spill]] %s3684_s3 }
   0x5   :  { %3740 = sst [smem:[#allocation54_spill]] %s3686_s5 }
   0x6   :  { %3741 = sst [smem:[#allocation55_spill]] %s3688_s7 }
   0x7   :  { %3742 = sst [smem:[#allocation56_spill]] %s3689_s8 }
   0x8   :  { %3743 = sst [smem:[#allocation57_spill]] %s3690_s9 }
   0x9   :  { %15 = vsyncpa [#allocation7], 0 }
   0xa   :  { %17 = vsyncpa [#allocation7 + $0x1], 0 }
   0xb   :  { %18 = vsyncpa [#allocation10], 0 }
   0xc   :  { %20 = vsyncpa [#allocation10 + $0x1], 0 }
   0xd   :  { %21 = vsyncpa [#allocation13], 0 }
   0xe   :  { %23 = vsyncpa [#allocation13 + $0x1], 0 }
   0xf   :  { %24 = vsyncpa [#allocation16], 0 }
  0x10   :  { %26 = vsyncpa [#allocation16 + $0x1], 0 }
  0x11   :  { %27 = vsyncpa [#allocation8], 0 }
  0x12   :  { %29 = vsyncpa [#allocation8 + $0x1], 0 }
  0x13   :  { %30 = vsyncpa [#allocation20], 0 }
  0x14   :  { %32 = vsyncpa [#allocation20 + $0x1], 0  ;;  %s2694_s30 = smov 0   ;;  %s2696_s10 = smov 0  }
  0x15   :  { %s2698_s11 = smov 0   ;;  %s2700_s12 = smov 0  }
  0x16   :  { %s2702_s13 = smov 0   ;;  %s2704_s14 = smov 0  }
  0x17   :  { %s2706_s15 = smov 0   ;;  %s2708_s16 = smov 0  }
  0x18   :  { %s2710_s17 = smov 0   ;;  %s2712_s18 = smov 0  }
  0x19   :  { %s2714_s19 = smov 0   ;;  %s2716_s20 = smov 0  }
  0x1a   :  { %s2718_s21 = smov 0   ;;  %s2720_s22 = smov 0  }
  0x1b LB: > { %3744 = sst [smem:[#allocation28_spill]] %s2572_s30  ;;  %s47_s23 = sadd.s32 1, %s2616_s20  ;;  %s2624_s22 = sphi %s2720_s22, %s38_s22   ;;  %s2620_s21 = sphi %s2718_s21, %s3845_s21   ;;  %s2616_s20 = sphi %s2716_s20, %s3844_s20   ;;  %s2612_s19 = sphi %s2714_s19, %s3843_s19   ;;  %s2608_s18 = sphi %s2712_s18, %s3850_s18   ;;  %s2604_s17 = sphi %s2710_s17, %s3841_s17   ;;  %s2600_s16 = sphi %s2708_s16, %s3840_s16   ;;  %s2596_s15 = sphi %s2706_s15, %s3839_s15   ;;  %s2592_s14 = sphi %s2704_s14, %s3838_s14   ;;  %s2588_s13 = sphi %s2702_s13, %s3849_s13   ;;  %s2584_s12 = sphi %s2700_s12, %s3848_s12   ;;  %s2580_s11 = sphi %s2698_s11, %s3836_s11   ;;  %s2576_s10 = sphi %s2696_s10, %s3847_s10   ;;  %s2572_s30 = sphi %s2694_s30, %s3846_s30  }
  0x1c   : > { %3745 = sst [smem:[#allocation29_spill]] %s2580_s11  ;;  %p3700_p0 = scmp.eq.s32.totalorder %s2624_s22, 0 }
  0x1d   : > { %3746 = sst [smem:[#allocation30_spill]] %s2592_s14  ;;  %p2766_p1 = scmp.ge.s32.totalorder %s47_s23, 2 }
  0x1e   : > { %3747 = sst [smem:[#allocation31_spill]] %s2596_s15  ;;  %s85_s25 = sadd.s32 1, %s2592_s14 }
  0x1f   : > { %3748 = sst [smem:[#allocation32_spill]] %s2600_s16  ;;  %p92_p2 = scmp.ne.s32.totalorder %s2592_s14, %s2588_s13 }
  0x20   : > { %3749 = sst [smem:[#allocation33_spill]] %s2604_s17  ;;  %s3852_s23 = smov (%p2766_p1, %s47_s23), 0 }
  0x21   : > { %3750 = sst [smem:[#allocation34_spill]] %s2608_s18  ;;  %p94_p4 = por %p92_p2, %p3700_p0 }
  0x22   : > { %3751 = sst [smem:[#allocation35_spill]] %s2612_s19  ;;  %s2783_s26 = ssub.s32 %s2616_s20, %s3852_s23 }
  0x23   : > { %3752 = sst [smem:[#allocation36_spill]] %s2616_s20  ;;  %p3699_p5 = scmp.lt.s32.totalorder %s2624_s22, 8 }
  0x24   : > { %3753 = sst [smem:[#allocation37_spill]] %s2620_s21  ;;  %p83_p6 = scmp.eq.s32.totalorder %s2783_s26, 0 }
  0x25   : > { %3754 = sst [smem:[#allocation38_spill]] %s2624_s22  ;;  %s2788_s27 = sand.u32 1, %s2624_s22  }
  0x26   : > { %s3755_s24 = scalar_select %p2766_p1, 1, 0 }
  0x27   : > { %3756 = sst [smem:[#allocation39_spill]] %s3852_s23  ;;  %s2791_s28 = sand.u32 1, %s2592_s14  }
  0x28   : > { %s2794_s29 = scalar_select %p83_p6, %s2592_s14, %s85_s25  }
  0x29   : > { %s1710_s9 = sshll.u32 %s2791_s28, 1  ;;  %s1753_s7 = sshll.u32 %s2616_s20, 5 }
  0x2a   : > { %3757 = sst [smem:[#allocation40_spill]] %s2794_s29  ;;  %s3758_s1 = sld [smem:[#allocation51_spill]] }
  0x2b   : > { %s355_s23 = scalar_lea.vmem [#allocation9], %s1710_s9  ;;  %p2805_p7 = pnand %p3699_p5, %p94_p4 }
  0x2c   : > { %s363_s2 = sshll.u32 %s355_s23, 4  ;;  %s3702_s29 = scalar_lea.sflag [#allocation10], %s2788_s27  ;;  %s2809_s2 = int_to_ptr.vmem [resolvable:$true] %s363_s2 }
  0x2d   : > { %s3759_s0 = scalar_select %p2805_p7, 1, 0 }
  0x2e   : > { %p2817_p9 = pneg %p2805_p7 }
  0x30   : > { %s2801_s18 = scalar_lea.hbm %s3758_s1, %s1753_s7  ;;  %s2201_s19 = scalar_lea.hbm %s3758_s1, 64 }
  0x31   : > { %s2196_s14 = scalar_lea.hbm %s2801_s18, 32  ;;  %p2202_p12 = scmp.lt.u32.totalorder %s2801_s18, %s3758_s1 }
  0x32   : > { %p2197_p8 = scmp.ne.s32.totalorder %s2801_s18, %s2196_s14  ;;  %p2203_p13 = scmp.lt.u32.totalorder %s2201_s19, %s2196_s14 }
  0x33   : > { %p2205_p4 = scmp.lt.u32.totalorder %s2196_s14, %s2801_s18 }
  0x34   : > { %p2199_p10 = pnand %p2817_p9, %p2197_p8  ;;  %p2204_p2 = por %p2203_p13, %p2202_p12 }
  0x36   : > { %p2200_p11 = pneg %p2199_p10  ;;  %p2206_p6 = por %p2205_p4, %p2204_p2 }
  0x38   : > { %p2207_p5 = pnand %p2206_p6, %p2200_p11 }
  0x3a   : > { %2210 = shalt.err (!%p2207_p5)
}
  0x3b   : > { %s2211_s25 = scalar_lea.vmem %s2809_s2, 32  ;;  %s2626_s8 = smov [#allocation9]  }
  0x3c   : > { %p2212_p8 = scmp.ne.s32.totalorder %s2809_s2, %s2211_s25  ;;  %s2216_s9 = sshll.u32 %s2626_s8, 4  ;;  %s2217_s9 = int_to_ptr.vmem [resolvable:$false] %s2216_s9 }
  0x3d   : > { %s2218_s15 = scalar_lea.vmem %s2217_s9, 64  ;;  %p2219_p3 = scmp.lt.s32.totalorder %s2809_s2, %s2217_s9 }
  0x3e   : > { %p2214_p10 = pnand %p2212_p8, %p2817_p9  ;;  %p2220_p1 = scmp.lt.s32.totalorder %s2218_s15, %s2211_s25 }
  0x40   : > { %p2215_p0 = pneg %p2214_p10  ;;  %p2221_p12 = por %p2220_p1, %p2219_p3 }
  0x42   : > { %p2222_p13 = pnand %p2221_p12, %p2215_p0 }
  0x44   : > { %2225 = shalt.err (!%p2222_p13)
}
  0x45   : > { %2045 = dma.hbm_to_vmem [thread:$0]  (!%p2805_p7), %s2801_s18, 32, %s2809_s2, %s3702_s29  }
  0x46   : > { %s3761_s14 = sshll.u32 %s2791_s28, 10  ;;  %s1717_s25 = sshll.u32 %s2791_s28, 9 }
  0x47   : > { %s374_s19 = scalar_lea.vmem [#allocation11], %s3761_s14  ;;  %p1729_p0 = scmp.ge.s32.totalorder %s2624_s22, 1 }
  0x48   : > { %s382_s23 = sshll.u32 %s374_s19, 4  ;;  %s418_s8 = scalar_lea.vmem [#allocation14], %s1717_s25  ;;  %s2844_s23 = int_to_ptr.vmem [resolvable:$true] %s382_s23 }
  0x49   : > { %3762 = sst [smem:[#allocation41_spill]] %s2844_s23  ;;  %s426_s9 = sshll.u32 %s418_s8, 4  ;;  %s2849_s9 = int_to_ptr.vmem [resolvable:$true] %s426_s9 }
  0x4a   : > { %p470_p1 = scmp.lt.s32.totalorder %s2624_s22, 9  ;;  %3763 = sst [smem:[#allocation42_spill]] %s2849_s9 }
  0x4b   : > { %s1757_s1 = sshll.u32 %s2616_s20, 13  ;;  %s3766_s3 = sld [smem:[#allocation53_spill]] }
  0x4c   : > { %p2851_p3 = pnand %p1729_p0, %p470_p1  ;;  %s396_s28 = scalar_lea.vmem [#allocation12], %s1717_s25 }
  0x4d   : > { %s404_s19 = sshll.u32 %s396_s28, 4  ;;  %s2866_s9 = scalar_lea.hbm %s3685_s4, %s1757_s1  ;;  %s2861_s19 = int_to_ptr.vmem [resolvable:$true] %s404_s19 }
  0x4e   : > { %s3764_s15 = scalar_select %p2851_p3, 1, 0 }
  0x50   : > { %3765 = sst [smem:[#allocation43_spill]] %s3764_s15  ;;  %s3709_s15 = scalar_lea.sflag [#allocation13], %s2788_s27 }
  0x51   : > { %s2859_s14 = scalar_lea.hbm %s3766_s3, %s1757_s1  ;;  %s2231_s20 = scalar_lea.hbm %s3766_s3, 16384 }
  0x52   : > { %s2226_s23 = scalar_lea.hbm %s2859_s14, 8192  ;;  %p2232_p4 = scmp.lt.u32.totalorder %s2859_s14, %s3766_s3 }
  0x53   : > { %p2227_p5 = scmp.ne.s32.totalorder %s2859_s14, %s2226_s23  ;;  %p2233_p6 = scmp.lt.u32.totalorder %s2231_s20, %s2226_s23 }
  0x54   : > { %p2235_p10 = scmp.lt.u32.totalorder %s2226_s23, %s2859_s14 }
  0x55   : > { %p2229_p11 = pnand %p2227_p5, %p2817_p9  ;;  %p2234_p8 = por %p2233_p6, %p2232_p4 }
  0x57   : > { %p2230_p2 = pneg %p2229_p11  ;;  %p2236_p12 = por %p2235_p10, %p2234_p8 }
  0x59   : > { %p2237_p13 = pnand %p2236_p12, %p2230_p2 }
  0x5b   : > { %2240 = shalt.err (!%p2237_p13)
}
  0x5c   : > { %s2241_s1 = scalar_lea.vmem %s2861_s19, 8192  ;;  %s2627_s29 = smov [#allocation12]  }
  0x5d   : > { %p2242_p0 = scmp.ne.s32.totalorder %s2861_s19, %s2241_s1  ;;  %s2246_s28 = sshll.u32 %s2627_s29, 4  ;;  %s2247_s28 = int_to_ptr.vmem [resolvable:$false] %s2246_s28 }
  0x5e   : > { %s2248_s16 = scalar_lea.vmem %s2247_s28, 16384  ;;  %p2249_p11 = scmp.lt.s32.totalorder %s2861_s19, %s2247_s28 }
  0x5f   : > { %p2244_p1 = pnand %p2242_p0, %p2817_p9  ;;  %p2250_p3 = scmp.lt.s32.totalorder %s2248_s16, %s2241_s1 }
  0x61   : > { %p2245_p5 = pneg %p2244_p1  ;;  %p2251_p4 = por %p2250_p3, %p2249_p11 }
  0x63   : > { %p2252_p6 = pnand %p2251_p4, %p2245_p5 }
  0x65   : > { %2255 = shalt.err (!%p2252_p6)
}
  0x66   : > { %s3710_s20 = smov 256   ;;  %s3711_s23 = smov 16  }
  0x67   : > { %2051 = dma.hbm_to_vmem [thread:$0]  (!%p2805_p7), %s2859_s14, 8192, %s2861_s19, %s3709_s15, %s3710_s20, %s3710_s20, %s3711_s23  }
  0x68   : > { %s2896_s8 = sadd.s32 4294967295, %s2624_s22   ;;  %s3713_s2 = sadd.s32 4294967294, %s2624_s22  }
  0x69   : > { %s50_s18 = sadd.s32 1, %s2620_s21  ;;  %p3721_p3 = scmp.eq.s32.totalorder %s2896_s8, 0 }
  0x6a   : > { %p3767_p2 = scmp.ne.s32.totalorder %s3755_s24, 0  ;;  %p3768_p8 = scmp.ne.s32.totalorder %s2588_s13, %s2584_s12 }
  0x6b   : > { %s189_s14 = sadd.s32 1, %s2580_s11  ;;  %p196_p13 = scmp.ne.s32.totalorder %s2580_s11, %s2576_s10 }
  0x6c   : > { %s3854_s18 = smov (!%p3767_p2, %s50_s18), %s2620_s21  ;;  %p2909_p10 = por %p3768_p8, %p3721_p3 }
  0x6d   : > { %p52_p12 = scmp.ge.s32.totalorder %s3854_s18, 4  ;;  %p202_p0 = scmp.ne.s32.totalorder %s2576_s10, %s2572_s30 }
  0x6e   : > { %s3769_s25 = scalar_select %p2909_p10, 1, 0 }
  0x6f   : > { %p252_p1 = scmp.eq.s32.totalorder %s2896_s8, 7  ;;  %s3856_s18 = smov (%p52_p12, %s3854_s18), 0 }
  0x70   : > { %3770 = sst [smem:[#allocation44_spill]] %s3856_s18  ;;  %p3771_p5 = scmp.eq.s32.totalorder %s2624_s22, 0 }
  0x71   : > { %p2929_p4 = por %p202_p0, %p3721_p3  ;;  %s2935_s19 = ssub.s32 %s2620_s21, %s3856_s18 }
  0x72   : > { %p2923_p11 = por %p196_p13, %p3771_p5  ;;  %p2937_p6 = por %p252_p1, %p196_p13 }
  0x73   : > { %s3773_s12 = scalar_select %p2929_p4, 1, 0 }
  0x74   : > { %s3775_s1 = scalar_select %p2937_p6, 1, 0 }
  0x75   : > { %3774 = sst [smem:[#allocation45_spill]] %s3773_s12  ;;  %p187_p2 = scmp.eq.s32.totalorder %s2935_s19, 0 }
  0x76   : > { %3776 = sst [smem:[#allocation46_spill]] %s3775_s1  ;;  %p258_p8 = scmp.eq.s32.totalorder %s3713_s2, 7 }
  0x77   : > { %s438_s29 = sand.u32 1, %s2580_s11   ;;  %s1726_s20 = sshll.u32 %s2620_s21, 7 }
  0x78   : > { %s2946_s28 = scalar_select %p187_p2, %s2580_s11, %s189_s14  }
  0x79   : > { %p2948_p12 = por %p258_p8, %p202_p0  ;;  %s2952_s15 = sshll.u32 %s438_s29, 3 }
  0x7a   : > { %3777 = sst [smem:[#allocation47_spill]] %s2946_s28  ;;  %s3780_s5 = sld [smem:[#allocation54_spill]] }
  0x7b   : > { %s3778_s16 = scalar_select %p2948_p12, 1, 0 }
  0x7c   : > { %s440_s2 = scalar_lea.vmem [#allocation15], %s2952_s15  ;;  %p3781_p13 = scmp.lt.s32.totalorder %s2624_s22, 8 }
  0x7d   : > { %3779 = sst [smem:[#allocation48_spill]] %s3778_s16  ;;  %s447_s14 = sshll.u32 %s440_s2, 4  ;;  %s2961_s14 = int_to_ptr.vmem [resolvable:$true] %s447_s14 }
  0x7e   : > { %p2967_p0 = pnand %p3781_p13, %p2923_p11  ;;  %s2974_s3 = scalar_lea.hbm %s3687_s6, %s1726_s20 }
  0x7f   : > { %s3727_s23 = scalar_lea.sflag [#allocation16], %s2788_s27 }
  0x80   : > { %s2958_s18 = scalar_lea.hbm %s3780_s5, %s1726_s20  ;;  %p3732_p5 = pneg %p2967_p0 }
  0x81   : > { %s3782_s29 = scalar_select %p2967_p0, 1, 0 }
  0x82   : > { %s2256_s16 = scalar_lea.hbm %s2958_s18, 128  ;;  %s2261_s30 = scalar_lea.hbm %s3780_s5, 512 }
  0x83   : > { %p2257_p1 = scmp.ne.s32.totalorder %s2958_s18, %s2256_s16  ;;  %p2262_p11 = scmp.lt.u32.totalorder %s2958_s18, %s3780_s5 }
  0x84   : > { %p2263_p13 = scmp.lt.u32.totalorder %s2261_s30, %s2256_s16  ;;  %p2265_p12 = scmp.lt.u32.totalorder %s2256_s16, %s2958_s18 }
  0x85   : > { %p2259_p2 = pnand %p3732_p5, %p2257_p1 }
  0x86   : > { %p2264_p3 = por %p2263_p13, %p2262_p11 }
  0x87   : > { %p2260_p8 = pneg %p2259_p2 }
  0x88   : > { %p2266_p6 = por %p2265_p12, %p2264_p3 }
  0x8a   : > { %p2267_p4 = pnand %p2266_p6, %p2260_p8 }
  0x8c   : > { %2270 = shalt.err (!%p2267_p4)
}
  0x8d   : > { %s2271_s11 = scalar_lea.vmem %s2961_s14, 128  ;;  %s2630_s20 = smov [#allocation15]  }
  0x8e   : > { %p2272_p1 = scmp.ne.s32.totalorder %s2961_s14, %s2271_s11  ;;  %s2276_s28 = sshll.u32 %s2630_s20, 4  ;;  %s2277_s28 = int_to_ptr.vmem [resolvable:$false] %s2276_s28 }
  0x8f   : > { %s2278_s12 = scalar_lea.vmem %s2277_s28, 256  ;;  %p2279_p7 = scmp.lt.s32.totalorder %s2961_s14, %s2277_s28 }
  0x90   : > { %p2274_p2 = pnand %p2272_p1, %p3732_p5  ;;  %p2280_p11 = scmp.lt.s32.totalorder %s2278_s12, %s2271_s11 }
  0x92   : > { %p2275_p10 = pneg %p2274_p2  ;;  %p2281_p13 = por %p2280_p11, %p2279_p7 }
  0x94   : > { %p2282_p3 = pnand %p2281_p13, %p2275_p10 }
  0x96   : > { %2285 = shalt.err (!%p2282_p3)
}
  0x97   : > { %s3783_s30 = sld [smem:[#allocation32_spill]]  ;;  %s3784_s1 = sld [smem:[#allocation31_spill]] }
  0x98   : > { %s3785_s16 = sld [smem:[#allocation36_spill]]  ;;  %s56_s2 = sor.u32 %s2783_s26, %s2935_s19 }
  0x99   : > { %2057 = dma.hbm_to_vmem [thread:$0]  (!%p2967_p0), %s2958_s18, 128, %s2961_s14, %s3727_s23  }
  0x9a   : > { %p57_p7 = scmp.eq.s32.totalorder %s56_s2, 0  ;;  %s59_s24 = sadd.s32 1, %s2604_s17 }
  0x9b   : > { %p3787_p6 = scmp.eq.s32.totalorder %s2624_s22, 0  ;;  %p3788_p8 = scmp.eq.s32.totalorder %s2896_s8, 0 }
  0x9c   : > { %s3012_s11 = scalar_select %p57_p7, %s2604_s17, %s59_s24  }
  0x9d   : > { %p66_p10 = scmp.ne.s32.totalorder %s2604_s17, %s3783_s30  ;;  %p72_p4 = scmp.ne.s32.totalorder %s3783_s30, %s3784_s1 }
  0x9e   : > { %3786 = sst [smem:[#allocation49_spill]] %s3012_s11  ;;  %s330_s28 = sand.u32 1, %s2604_s17  }
  0x9f   : > { %p68_p12 = por %p3787_p6, %p66_p10  ;;  %p3018_p1 = por %p3788_p8, %p72_p4 }
  0xa0   : > { %s1707_s12 = sshll.u32 %s3785_s16, 1  ;;  %s1706_s5 = sshll.u32 %s330_s28, 4 }
  0xa1   : > { %s3789_s20 = scalar_select %p3018_p1, 1, 0 }
  0xa2   : > { %s1708_s18 = sshll.u32 %s2620_s21, 2  ;;  %s334_s19 = scalar_lea.vmem [#allocation6], %s1706_s5 }
  0xa3   : > { %s340_s26 = sadd.s32 %s1708_s18, %s1707_s12  ;;  %s344_s14 = sshll.u32 %s334_s19, 4  ;;  %s3025_s14 = int_to_ptr.vmem [resolvable:$true] %s344_s14 }
  0xa4   : > { %s1709_s2 = sshll.u32 %s340_s26, 7  ;;  %s3790_s24 = sld [smem:[#allocation50_spill]] }
  0xa5   : > { %p3791_p2 = scmp.lt.s32.totalorder %s2624_s22, 8  ;;  %s1755_s5 = sshll.u32 %s3785_s16, 14 }
  0xa6   : > { %s3793_s26 = sld [smem:[#allocation52_spill]]  ;;  %s331_s30 = scalar_lea.sflag [#allocation7], %s330_s28 }
  0xa7   : > { %p3034_p11 = pnand %p3791_p2, %p68_p12 }
  0xa9   : > { %p2288_p3 = pneg %p3034_p11 }
  0xaa   : > { %s3030_s23 = scalar_lea.hbm %s3790_s24, %s1709_s2  ;;  %s2291_s17 = scalar_lea.hbm %s3790_s24, 2048 }
  0xab   : > { %s2286_s2 = scalar_lea.hbm %s3030_s23, 256  ;;  %p2292_p4 = scmp.lt.u32.totalorder %s3030_s23, %s3790_s24 }
  0xac   : > { %s3042_s19 = scalar_lea.hbm %s3793_s26, %s1755_s5  ;;  %p2287_p13 = scmp.ne.s32.totalorder %s3030_s23, %s2286_s2 }
  0xad   : > { %p2293_p6 = scmp.lt.u32.totalorder %s2291_s17, %s2286_s2  ;;  %p2295_p8 = scmp.lt.u32.totalorder %s2286_s2, %s3030_s23 }
  0xae   : > { %p2289_p7 = pnand %p2288_p3, %p2287_p13 }
  0xaf   : > { %p2294_p12 = por %p2293_p6, %p2292_p4 }
  0xb0   : > { %p2290_p10 = pneg %p2289_p7 }
  0xb1   : > { %p2296_p2 = por %p2295_p8, %p2294_p12 }
  0xb3   : > { %p2297_p5 = pnand %p2296_p2, %p2290_p10 }
  0xb5   : > { %2300 = shalt.err (!%p2297_p5)
}
  0xb6   : > { %s2301_s28 = scalar_lea.vmem %s3025_s14, 256  ;;  %s2631_s21 = smov [#allocation6]  }
  0xb7   : > { %p2302_p13 = scmp.ne.s32.totalorder %s3025_s14, %s2301_s28  ;;  %s2306_s5 = sshll.u32 %s2631_s21, 4  ;;  %s2307_s5 = int_to_ptr.vmem [resolvable:$false] %s2306_s5 }
  0xb8   : > { %s2308_s22 = scalar_lea.vmem %s2307_s5, 512  ;;  %p2309_p0 = scmp.lt.s32.totalorder %s3025_s14, %s2307_s5 }
  0xb9   : > { %p2304_p7 = pnand %p2302_p13, %p2288_p3  ;;  %p2310_p4 = scmp.lt.s32.totalorder %s2308_s22, %s2301_s28 }
  0xbb   : > { %p2305_p1 = pneg %p2304_p7  ;;  %p2311_p6 = por %p2310_p4, %p2309_p0 }
  0xbd   : > { %p2312_p12 = pnand %p2311_p6, %p2305_p1 }
  0xbf   : > { %2315 = shalt.err (!%p2312_p12)
}
  0xc0   : > { %2042 = dma.hbm_to_vmem [thread:$0]  (!%p3034_p11), %s3030_s23, 256, %s3025_s14, %s331_s30  }
  0xc1   : > { %s458_s17 = scalar_lea.vmem [#allocation17], %s2952_s15  ;;  %s2316_s18 = scalar_lea.hbm %s3042_s19, 16384 }
  0xc2   : > { %s3070_s12 = sshll.u32 %s458_s17, 4  ;;  %p2317_p5 = scmp.ne.s32.totalorder %s3042_s19, %s2316_s18  ;;  %s466_s12 = int_to_ptr.vmem [resolvable:$true] %s3070_s12 }
  0xc3   : > { %s2321_s11 = scalar_lea.hbm %s3793_s26, 32768  ;;  %p2322_p3 = scmp.lt.u32.totalorder %s3042_s19, %s3793_s26 }
  0xc4   : > { %p2319_p0 = pnand %p2317_p5, %p2817_p9  ;;  %p2323_p10 = scmp.lt.u32.totalorder %s2321_s11, %s2316_s18 }
  0xc5   : > { %p2325_p2 = scmp.lt.u32.totalorder %s2316_s18, %s3042_s19 }
  0xc6   : > { %p2320_p1 = pneg %p2319_p0  ;;  %p2324_p8 = por %p2323_p10, %p2322_p3 }
  0xc8   : > { %p2326_p11 = por %p2325_p2, %p2324_p8 }
  0xca   : > { %p2327_p13 = pnand %p2326_p11, %p2320_p1 }
  0xcc   : > { %2330 = shalt.err (!%p2327_p13)
}
  0xcd   : > { %s3794_s15 = sld [smem:[#allocation41_spill]]  ;;  %s2632_s14 = smov [#allocation11]  }
  0xce   : > { %s2336_s30 = sshll.u32 %s2632_s14, 4  ;;  %s2337_s30 = int_to_ptr.vmem [resolvable:$false] %s2336_s30 }
  0xcf   : > { %s2338_s21 = scalar_lea.vmem %s2337_s30, 32768 }
  0xd3   : > { %s2331_s23 = scalar_lea.vmem %s3794_s15, 16384  ;;  %p2339_p12 = scmp.lt.s32.totalorder %s3794_s15, %s2337_s30 }
  0xd4   : > { %p2332_p7 = scmp.ne.s32.totalorder %s3794_s15, %s2331_s23  ;;  %p2340_p5 = scmp.lt.s32.totalorder %s2338_s21, %s2331_s23 }
  0xd6   : > { %p2334_p4 = pnand %p2332_p7, %p2817_p9  ;;  %p2341_p0 = por %p2340_p5, %p2339_p12 }
  0xd8   : > { %p2335_p6 = pneg %p2334_p4 }
  0xda   : > { %p2342_p3 = pnand %p2341_p0, %p2335_p6 }
  0xdc   : > { %2345 = shalt.err (!%p2342_p3)
}
  0xdd   : > { %s2633_s5 = smov 512   ;;  %s2634_s22 = smov 32  }
  0xde   : > { %p3795_p1 = scmp.ne.s32.totalorder %s3759_s0, 0  ;;  %s3796_s17 = scalar_lea.sflag [#allocation10], %s2788_s27 }
  0xdf   : > { %s2346_s18 = scalar_lea.hbm %s2866_s9, 8192  ;;  %s2351_s11 = scalar_lea.hbm %s3685_s4, 16384 }
  0xe0   : > { %2048 = dma.hbm_to_vmem [thread:$0]  (!%p3795_p1), %s3042_s19, 16384, %s3794_s15, %s3796_s17, %s2633_s5, %s2633_s5, %s2634_s22  }
  0xe1   : > { %p2347_p10 = scmp.ne.s32.totalorder %s2866_s9, %s2346_s18  ;;  %p2352_p11 = scmp.lt.u32.totalorder %s2866_s9, %s3685_s4 }
  0xe2   : > { %p2353_p13 = scmp.lt.u32.totalorder %s2351_s11, %s2346_s18  ;;  %p2355_p4 = scmp.lt.u32.totalorder %s2346_s18, %s2866_s9 }
  0xe3   : > { %p2349_p8 = pnand %p2347_p10, %p2817_p9 }
  0xe4   : > { %p2354_p7 = por %p2353_p13, %p2352_p11 }
  0xe5   : > { %p2350_p2 = pneg %p2349_p8 }
  0xe6   : > { %p2356_p6 = por %p2355_p4, %p2354_p7 }
  0xe8   : > { %p2357_p12 = pnand %p2356_p6, %p2350_p2 }
  0xea   : > { %2360 = shalt.err (!%p2357_p12)
}
  0xeb   : > { %s3797_s19 = sld [smem:[#allocation42_spill]]  ;;  %s2635_s23 = smov [#allocation14]  }
  0xec   : > { %s2366_s14 = sshll.u32 %s2635_s23, 4  ;;  %s2367_s14 = int_to_ptr.vmem [resolvable:$false] %s2366_s14 }
  0xed   : > { %s2368_s30 = scalar_lea.vmem %s2367_s14, 16384 }
  0xf1   : > { %s2361_s15 = scalar_lea.vmem %s3797_s19, 8192  ;;  %p2369_p10 = scmp.lt.s32.totalorder %s3797_s19, %s2367_s14 }
  0xf2   : > { %p2362_p5 = scmp.ne.s32.totalorder %s3797_s19, %s2361_s15  ;;  %p2370_p8 = scmp.lt.s32.totalorder %s2368_s30, %s2361_s15 }
  0xf4   : > { %p2364_p0 = pnand %p2362_p5, %p2817_p9  ;;  %p2371_p11 = por %p2370_p8, %p2369_p10 }
  0xf6   : > { %p2365_p3 = pneg %p2364_p0 }
  0xf8   : > { %p2372_p13 = pnand %p2371_p11, %p2365_p3 }
  0xfa   : > { %2375 = shalt.err (!%p2372_p13)
}
  0xfb   : > { %s3798_s21 = smov 16   ;;  %s3799_s5 = smov 256  }
  0xfc   : > { %s3800_s22 = scalar_lea.sflag [#allocation13], %s2788_s27  ;;  %s2376_s7 = scalar_lea.hbm %s2974_s3, 128 }
  0xfd   : > { %2054 = dma.hbm_to_vmem [thread:$0]  (!%p3795_p1), %s2866_s9, 8192, %s3797_s19, %s3800_s22, %s3799_s5, %s3799_s5, %s3798_s21  }
  0xfe   : > { %p2377_p9 = scmp.ne.s32.totalorder %s2974_s3, %s2376_s7  ;;  %p3801_p2 = scmp.ne.s32.totalorder %s3782_s29, 0 }
  0xff   : > { %s2381_s18 = scalar_lea.hbm %s3687_s6, 512  ;;  %p2382_p12 = scmp.lt.u32.totalorder %s2974_s3, %s3687_s6 }
 0x100   : > { %p3802_p7 = pneg %p3801_p2  ;;  %p2383_p5 = scmp.lt.u32.totalorder %s2381_s18, %s2376_s7 }
 0x101   : > { %p2385_p3 = scmp.lt.u32.totalorder %s2376_s7, %s2974_s3 }
 0x102   : > { %p2379_p4 = pnand %p2377_p9, %p3802_p7  ;;  %p2384_p0 = por %p2383_p5, %p2382_p12 }
 0x104   : > { %p2380_p6 = pneg %p2379_p4  ;;  %p2386_p10 = por %p2385_p3, %p2384_p0 }
 0x106   : > { %p2387_p1 = pnand %p2386_p10, %p2380_p6 }
 0x108   : > { %2390 = shalt.err (!%p2387_p1)
}
 0x109   : > { %s2391_s9 = scalar_lea.vmem %s466_s12, 128  ;;  %p3803_p11 = pmov %p3802_p7 }
 0x10a   : > { %p2392_p8 = scmp.ne.s32.totalorder %s466_s12, %s2391_s9  ;;  %s2636_s11 = smov [#allocation17]  }
 0x10b   : > { %s2396_s16 = sshll.u32 %s2636_s11, 4  ;;  %s2397_s16 = int_to_ptr.vmem [resolvable:$false] %s2396_s16 }
 0x10c   : > { %p2394_p13 = pnand %p2392_p8, %p3803_p11  ;;  %s2398_s28 = scalar_lea.vmem %s2397_s16, 256 }
 0x10d   : > { %p2399_p7 = scmp.lt.s32.totalorder %s466_s12, %s2397_s16  ;;  %p2400_p4 = scmp.lt.s32.totalorder %s2398_s28, %s2391_s9 }
 0x10e   : > { %p2395_p9 = pneg %p2394_p13 }
 0x10f   : > { %p2401_p5 = por %p2400_p4, %p2399_p7 }
 0x111   : > { %p2402_p12 = pnand %p2401_p5, %p2395_p9 }
 0x113   : > { %2405 = shalt.err (!%p2402_p12)
}
 0x114   : > { %s3804_s19 = scalar_lea.sflag [#allocation16], %s2788_s27  ;;  %s3805_s15 = sld [smem:[#allocation43_spill]] }
 0x115   : > { %2060 = dma.hbm_to_vmem [thread:$0]  (!%p3801_p2), %s2974_s3, 128, %s466_s12, %s3804_s19  }
 0x11a   : > { %p3806_p6 = scmp.ne.s32.totalorder %s3805_s15, 0 }
 0x11b   : > { %s3807_s23 = sld [smem:[#allocation32_spill]] (!%p3806_p6)  ;;  %p3808_p0 = scmp.ne.s32.totalorder (!%p3806_p6), %s3789_s20, 0 }
 0x11c   : > { %474 = sbr.rel (%p3806_p6) target bundleno = 888 (0x378), region = 48 }
 0x121   : > { %s476_s14 = sand.u32 (!%p3806_p6), 1, %s3807_s23  }
 0x122   : > { %s3146_s30 = sshll.u32 (!%p3806_p6), %s476_s14, 4  ;;  %s477_s21 = scalar_lea.sflag (!%p3806_p6), [#allocation7], %s476_s14 }
 0x123   : > { %s480_s5 = scalar_lea.vmem [#allocation6], %s3146_s30 }
 0x124   : > { %2547 = dma.done.wait (%p3808_p0), %s477_s21, 256  }
 0x125   : > { %2549 = vsyncadd (%p3808_p0), %s477_s21, 4294967040  ;;  %s3154_s27 = sand.u32 1, %s2896_s8   ;;  %s487_s29 = sand.u32 1, %s2588_s13  }
 0x126   : > { %s1731_s3 = sshll.u32 %s487_s29, 1  ;;  %s486_s12 = scalar_lea.sflag [#allocation10], %s3154_s27 }
 0x127   : > { %s3158_s22 = scalar_lea.vmem [#allocation9], %s1731_s3  ;;  %p3809_p2 = scmp.ne.s32.totalorder %s3769_s25, 0 }
 0x129   : > { %2551 = dma.done.wait (%p3809_p2), %s486_s12, 16416  }
 0x12a   : > { %2553 = vsyncadd (%p3809_p2), %s486_s12, 4294950880  ;;  %s1732_s20 = sshll.u32 %s487_s29, 10  ;;  %s1733_s7 = sshll.u32 %s487_s29, 9 }
 0x12b   : > { %s3164_s0 = scalar_lea.vmem [#allocation11], %s1732_s20  ;;  %s504_s17 = scalar_lea.sflag [#allocation13], %s3154_s27 }
 0x12c   : > { %s3167_s8 = scalar_lea.vmem [#allocation12], %s1733_s7 }
 0x12d   : > { %2555 = dma.done.wait (%p3809_p2), %s504_s17, 16384  }
 0x12e   : > { %2557 = vsyncadd (%p3809_p2), %s504_s17, 4294950912  ;;  %s3810_s18 = sld [smem:[#allocation45_spill]]  ;;  %s3174_s2 = sand.u32 1, %s2576_s10  }
 0x12f   : > { %s1735_s1 = sshll.u32 %s3174_s2, 3  ;;  %s3177_s9 = scalar_lea.vmem [#allocation14], %s1733_s7 }
 0x130   : > { %s522_s11 = scalar_lea.sflag [#allocation16], %s3154_s27  ;;  %s3180_s16 = scalar_lea.vmem [#allocation15], %s1735_s1 }
 0x134   : > { %p3811_p3 = scmp.ne.s32.totalorder %s3810_s18, 0 }
 0x136   : > { %2559 = dma.done.wait (%p3811_p3), %s522_s11, 256  }
 0x137   : > { %2561 = vsyncadd (%p3811_p3), %s522_s11, 4294967040  ;;  %s1737_s25 = sshll.u32 %s3174_s2, 5  ;;  %s1738_s28 = sshll.u32 %s3174_s2, 4 }
 0x138   : > { %s3188_s19 = scalar_lea.vmem [#allocation17], %s1735_s1  ;;  %s3190_s15 = scalar_lea.vmem [#allocation18], %s1737_s25 }
 0x139   : > { %s3192_s23 = scalar_lea.vmem [#allocation19], %s1738_s28  ;;  %s3194_s14 = scalar_lea.vmem [#allocation21], %s1738_s28 }
 0x13a   : > { %s3812_s21 = sld [smem:[#allocation34_spill]] }
 0x140   : > { %p1740_p10 = scmp.ne.s32.totalorder %s3812_s21, 0 }
 0x141   : > { %vm626_vm0 = vcmask (!%p1740_p10), 7168   ;;  %v2637_v0 = vmov (!%p1740_p10), 0.0  }
 0x142   : > { %617 = sbr.rel (%p1740_p10) target bundleno = 329 (0x149), region = 80  ;;  %618 = vst [vmem:[#allocation2] sm:$0xff] (!%p1740_p10), %v2637_v0  ;;  %619 = vst [vmem:[#allocation2 + $0x8] sm:$0xff] (!%p1740_p10), %v2637_v0 }
 0x143   : > { %620 = vst [vmem:[#allocation2 + $0x10] sm:$0xff] (!%p1740_p10), %v2637_v0  ;;  %621 = vst [vmem:[#allocation2 + $0x18] sm:$0xff] (!%p1740_p10), %v2637_v0 }
 0x144   : > { %622 = vst [vmem:[#allocation3] sm:$0xff] (!%p1740_p10), %v2637_v0  ;;  %623 = vst [vmem:[#allocation3 + $0x8] sm:$0xff] (!%p1740_p10), %v2637_v0 }
 0x145   : > { %624 = vst [vmem:[#allocation4] sm:$0xff] (!%p1740_p10), %v2637_v0  ;;  %625 = vst [vmem:[#allocation4 + $0x8] sm:$0xff] (!%p1740_p10), %v2637_v0 }
 0x146   : > { %627 = vst.msk [vmem:[#allocation5] sm:$0xff] (!%p1740_p10), %vm626_vm0, %v2637_v0 }
 0x149 PF: > { %v658_v1 = vld [vmem:[%s3164_s0 + $0x8] sm:$0xff]  ;;  %v660_v3 = vld [vmem:[%s3164_s0 + $0x18] sm:$0xff]  ;;  %v657_v6 = vld [vmem:[%s3164_s0] sm:$0xff]  ;;  %vm637_vm1 = vcmask 7168   ;;  %s3813_s30 = sld [smem:[#allocation34_spill]] }
 0x14a   : > { %v662_v2 = vld [vmem:[%s3164_s0 + $0x28] sm:$0xff]  ;;  %v664_v5 = vld [vmem:[%s3164_s0 + $0x38] sm:$0xff]  ;;  %v661_v7 = vld [vmem:[%s3164_s0 + $0x20] sm:$0xff] }
 0x14b   : > { %v1763_v4 = vpack.c.bf16 %v662_v2, %v658_v1  ;;  %v1827_v8 = vpack.c.bf16 %v664_v5, %v660_v3  ;;  %v1765_v9 = vpack.c.bf16 %v661_v7, %v657_v6  ;;  %v659_v10 = vld [vmem:[%s3164_s0 + $0x10] sm:$0xff]  ;;  %v666_v12 = vld [vmem:[%s3164_s0 + $0x48] sm:$0xff]  ;;  %v668_v15 = vld [vmem:[%s3164_s0 + $0x58] sm:$0xff] }
 0x14c   : > { %v663_v11 = vld [vmem:[%s3164_s0 + $0x30] sm:$0xff]  ;;  %v670_v14 = vld [vmem:[%s3164_s0 + $0x68] sm:$0xff]  ;;  %v672_v16 = vld [vmem:[%s3164_s0 + $0x78] sm:$0xff] }
 0x14d   : > { %1764 = vmatprep.subr.bf16.mxu0 %v1763_v4  ;;  %v1829_v13 = vpack.c.bf16 %v663_v11, %v659_v10  ;;  %1828 = vmatprep.subr.bf16.mxu1 %v1827_v8  ;;  %v1767_v17 = vpack.c.bf16 %v670_v14, %v666_v12  ;;  %v1831_v18 = vpack.c.bf16 %v672_v16, %v668_v15  ;;  %v665_v19 = vld [vmem:[%s3164_s0 + $0x40] sm:$0xff]  ;;  %v667_v21 = vld [vmem:[%s3164_s0 + $0x50] sm:$0xff]  ;;  %v674_v24 = vld [vmem:[%s3164_s0 + $0x88] sm:$0xff] }
 0x14e   : > { %1766 = vmatpush1.bf16.msra.mxu0 %v1765_v9  ;;  %v669_v20 = vld [vmem:[%s3164_s0 + $0x60] sm:$0xff]  ;;  %v671_v23 = vld [vmem:[%s3164_s0 + $0x70] sm:$0xff]  ;;  %v678_v25 = vld [vmem:[%s3164_s0 + $0xa8] sm:$0xff] }
 0x14f   : > { %1830 = vmatpush1.bf16.msra.mxu1 %v1829_v13  ;;  %v1769_v22 = vpack.c.bf16 %v669_v20, %v665_v19  ;;  %1768 = vmatprep.subr.bf16.mxu0 %v1767_v17  ;;  %v1833_v26 = vpack.c.bf16 %v671_v23, %v667_v21  ;;  %v1771_v27 = vpack.c.bf16 %v678_v25, %v674_v24  ;;  %v676_v28 = vld [vmem:[%s3164_s0 + $0x98] sm:$0xff]  ;;  %v673_v30 = vld [vmem:[%s3164_s0 + $0x80] sm:$0xff]  ;;  %v675_v33 = vld [vmem:[%s3164_s0 + $0x90] sm:$0xff]  ;;  %p1741_p1 = scmp.ne.s32.totalorder %s3813_s30, 1 }
 0x150   : > { %1832 = vmatprep.subr.bf16.mxu1 %v1831_v18  ;;  %v680_v29 = vld [vmem:[%s3164_s0 + $0xb8] sm:$0xff]  ;;  %v677_v32 = vld [vmem:[%s3164_s0 + $0xa0] sm:$0xff]  ;;  %v679_v34 = vld [vmem:[%s3164_s0 + $0xb0] sm:$0xff]  ;;  %s2640_s29 = smov (!%p1741_p1), 1  }
 0x151   : > { %v1835_v31 = vpack.c.bf16 %v680_v29, %v676_v28  ;;  %v1773_v35 = vpack.c.bf16 %v677_v32, %v673_v30  ;;  %v682_v36 = vld [vmem:[%s3164_s0 + $0xc8] sm:$0xff]  ;;  %v684_v38 = vld [vmem:[%s3164_s0 + $0xd8] sm:$0xff]  ;;  %v1837_v39 = vpack.c.bf16 %v679_v34, %v675_v33  ;;  %v681_v42 = vld [vmem:[%s3164_s0 + $0xc0] sm:$0xff] }
 0x152   : > { %1770 = vmatpush1.bf16.msra.mxu0 %v1769_v22  ;;  %v686_v37 = vld [vmem:[%s3164_s0 + $0xe8] sm:$0xff]  ;;  %v688_v41 = vld [vmem:[%s3164_s0 + $0xf8] sm:$0xff]  ;;  %v685_v43 = vld [vmem:[%s3164_s0 + $0xe0] sm:$0xff] }
 0x153   : > { %1834 = vmatpush1.bf16.msra.mxu1 %v1833_v26  ;;  %1772 = vmatprep.subr.bf16.mxu0 %v1771_v27  ;;  %v1775_v40 = vpack.c.bf16 %v686_v37, %v682_v36  ;;  %v1839_v44 = vpack.c.bf16 %v688_v41, %v684_v38  ;;  %v683_v45 = vld [vmem:[%s3164_s0 + $0xd0] sm:$0xff]  ;;  %v690_v47 = vld [vmem:[%s3164_s0 + $0x108] sm:$0xff]  ;;  %v692_v49 = vld [vmem:[%s3164_s0 + $0x118] sm:$0xff]  ;;  %v1777_v51 = vpack.c.bf16 %v685_v43, %v681_v42 }
 0x154   : > { %1836 = vmatprep.subr.bf16.mxu1 %v1835_v31  ;;  %v687_v46 = vld [vmem:[%s3164_s0 + $0xf0] sm:$0xff]  ;;  %v694_v48 = vld [vmem:[%s3164_s0 + $0x128] sm:$0xff]  ;;  %v696_v50 = vld [vmem:[%s3164_s0 + $0x138] sm:$0xff] }
 0x155   : > { %v1841_v52 = vpack.c.bf16 %v687_v46, %v683_v45  ;;  %v1779_v53 = vpack.c.bf16 %v694_v48, %v690_v47  ;;  %v689_v54 = vld [vmem:[%s3164_s0 + $0x100] sm:$0xff]  ;;  %v691_v56 = vld [vmem:[%s3164_s0 + $0x110] sm:$0xff]  ;;  %v1843_v57 = vpack.c.bf16 %v696_v50, %v692_v49  ;;  %v698_v59 = vld [vmem:[%s3164_s0 + $0x148] sm:$0xff]  ;;  %v641_v48 = vlaneseq }
 0x156   : > { %1774 = vmatpush1.bf16.msra.mxu0 %v1773_v35  ;;  %v693_v55 = vld [vmem:[%s3164_s0 + $0x120] sm:$0xff]  ;;  %v695_v58 = vld [vmem:[%s3164_s0 + $0x130] sm:$0xff]  ;;  %v702_v60 = vld [vmem:[%s3164_s0 + $0x168] sm:$0xff] }
 0x157   : > { %1838 = vmatpush1.bf16.msra.mxu1 %v1837_v39  ;;  %1776 = vmatprep.subr.bf16.mxu0 %v1775_v40  ;;  %v700_v61 = vld [vmem:[%s3164_s0 + $0x158] sm:$0xff]  ;;  %v1781_v63 = vpack.c.bf16 %v693_v55, %v689_v54  ;;  %v1845_v0 = vpack.c.bf16 %v695_v58, %v691_v56  ;;  %v1783_v1 = vpack.c.bf16 %v702_v60, %v698_v59  ;;  %v697_v2 = vld [vmem:[%s3164_s0 + $0x140] sm:$0xff]  ;;  %v699_v4 = vld [vmem:[%s3164_s0 + $0x150] sm:$0xff] }
 0x158   : > { %1840 = vmatprep.subr.bf16.mxu1 %v1839_v44  ;;  %v704_v62 = vld [vmem:[%s3164_s0 + $0x178] sm:$0xff]  ;;  %v701_v3 = vld [vmem:[%s3164_s0 + $0x160] sm:$0xff]  ;;  %v703_v6 = vld [vmem:[%s3164_s0 + $0x170] sm:$0xff] }
 0x159   : > { %v1847_v5 = vpack.c.bf16 %v704_v62, %v700_v61  ;;  %v706_v7 = vld [vmem:[%s3164_s0 + $0x188] sm:$0xff]  ;;  %v708_v9 = vld [vmem:[%s3164_s0 + $0x198] sm:$0xff]  ;;  %v1785_v11 = vpack.c.bf16 %v701_v3, %v697_v2  ;;  %v1849_v12 = vpack.c.bf16 %v703_v6, %v699_v4  ;;  %v705_v14 = vld [vmem:[%s3164_s0 + $0x180] sm:$0xff]  ;;  %v3282_v61 = vshrl.u32 %v641_v48, 7 }
 0x15a   : > { %1778 = vmatpush1.bf16.msra.mxu0 %v1777_v51  ;;  %v710_v8 = vld [vmem:[%s3164_s0 + $0x1a8] sm:$0xff]  ;;  %v712_v10 = vld [vmem:[%s3164_s0 + $0x1b8] sm:$0xff]  ;;  %v709_v15 = vld [vmem:[%s3164_s0 + $0x1a0] sm:$0xff] }
 0x15b   : > { %1842 = vmatpush1.bf16.msra.mxu1 %v1841_v52  ;;  %1780 = vmatprep.subr.bf16.mxu0 %v1779_v53  ;;  %v1787_v13 = vpack.c.bf16 %v710_v8, %v706_v7  ;;  %v707_v16 = vld [vmem:[%s3164_s0 + $0x190] sm:$0xff]  ;;  %v1851_v17 = vpack.c.bf16 %v712_v10, %v708_v9  ;;  %v714_v19 = vld [vmem:[%s3164_s0 + $0x1c8] sm:$0xff]  ;;  %v716_v21 = vld [vmem:[%s3164_s0 + $0x1d8] sm:$0xff]  ;;  %v1789_v23 = vpack.c.bf16 %v709_v15, %v705_v14 }
 0x15c   : > { %1844 = vmatprep.subr.bf16.mxu1 %v1843_v57  ;;  %v711_v18 = vld [vmem:[%s3164_s0 + $0x1b0] sm:$0xff]  ;;  %v718_v20 = vld [vmem:[%s3164_s0 + $0x1e8] sm:$0xff]  ;;  %v720_v22 = vld [vmem:[%s3164_s0 + $0x1f8] sm:$0xff] }
 0x15d   : > { %v1853_v24 = vpack.c.bf16 %v711_v18, %v707_v16  ;;  %v1791_v25 = vpack.c.bf16 %v718_v20, %v714_v19  ;;  %v713_v26 = vld [vmem:[%s3164_s0 + $0x1c0] sm:$0xff]  ;;  %v715_v28 = vld [vmem:[%s3164_s0 + $0x1d0] sm:$0xff]  ;;  %v1855_v29 = vpack.c.bf16 %v720_v22, %v716_v21  ;;  %v722_v31 = vld [vmem:[%s3164_s0 + $0x208] sm:$0xff] }
 0x15e   : > { %1782 = vmatpush1.bf16.msra.mxu0 %v1781_v63  ;;  %v717_v27 = vld [vmem:[%s3164_s0 + $0x1e0] sm:$0xff]  ;;  %v719_v30 = vld [vmem:[%s3164_s0 + $0x1f0] sm:$0xff]  ;;  %v726_v32 = vld [vmem:[%s3164_s0 + $0x228] sm:$0xff] }
 0x15f   : > { %1846 = vmatpush1.bf16.msra.mxu1 %v1845_v0  ;;  %1784 = vmatprep.subr.bf16.mxu0 %v1783_v1  ;;  %v724_v33 = vld [vmem:[%s3164_s0 + $0x218] sm:$0xff]  ;;  %v1793_v35 = vpack.c.bf16 %v717_v27, %v713_v26  ;;  %v1857_v36 = vpack.c.bf16 %v719_v30, %v715_v28  ;;  %v1795_v37 = vpack.c.bf16 %v726_v32, %v722_v31  ;;  %v721_v38 = vld [vmem:[%s3164_s0 + $0x200] sm:$0xff]  ;;  %v723_v40 = vld [vmem:[%s3164_s0 + $0x210] sm:$0xff] }
 0x160   : > { %1848 = vmatprep.subr.bf16.mxu1 %v1847_v5  ;;  %v728_v34 = vld [vmem:[%s3164_s0 + $0x238] sm:$0xff]  ;;  %v725_v39 = vld [vmem:[%s3164_s0 + $0x220] sm:$0xff]  ;;  %v727_v42 = vld [vmem:[%s3164_s0 + $0x230] sm:$0xff] }
 0x161   : > { %v1859_v41 = vpack.c.bf16 %v728_v34, %v724_v33  ;;  %v730_v43 = vld [vmem:[%s3164_s0 + $0x248] sm:$0xff]  ;;  %v732_v45 = vld [vmem:[%s3164_s0 + $0x258] sm:$0xff]  ;;  %v1797_v47 = vpack.c.bf16 %v725_v39, %v721_v38  ;;  %v1861_v49 = vpack.c.bf16 %v727_v42, %v723_v40  ;;  %v729_v51 = vld [vmem:[%s3164_s0 + $0x240] sm:$0xff] }
 0x162   : > { %1786 = vmatpush1.bf16.msra.mxu0 %v1785_v11  ;;  %v734_v44 = vld [vmem:[%s3164_s0 + $0x268] sm:$0xff]  ;;  %v736_v46 = vld [vmem:[%s3164_s0 + $0x278] sm:$0xff]  ;;  %v733_v52 = vld [vmem:[%s3164_s0 + $0x260] sm:$0xff] }
 0x163   : > { %1850 = vmatpush1.bf16.msra.mxu1 %v1849_v12  ;;  %1788 = vmatprep.subr.bf16.mxu0 %v1787_v13  ;;  %v1799_v50 = vpack.c.bf16 %v734_v44, %v730_v43  ;;  %v731_v53 = vld [vmem:[%s3164_s0 + $0x250] sm:$0xff]  ;;  %v1863_v54 = vpack.c.bf16 %v736_v46, %v732_v45  ;;  %v738_v56 = vld [vmem:[%s3164_s0 + $0x288] sm:$0xff]  ;;  %v740_v58 = vld [vmem:[%s3164_s0 + $0x298] sm:$0xff]  ;;  %v1801_v60 = vpack.c.bf16 %v733_v52, %v729_v51  ;;  %v647_v12 = vsub.s32 1, %v3282_v61 }
 0x164   : > { %1852 = vmatprep.subr.bf16.mxu1 %v1851_v17  ;;  %v735_v55 = vld [vmem:[%s3164_s0 + $0x270] sm:$0xff]  ;;  %v742_v57 = vld [vmem:[%s3164_s0 + $0x2a8] sm:$0xff]  ;;  %v744_v59 = vld [vmem:[%s3164_s0 + $0x2b8] sm:$0xff] }
 0x165   : > { %v1865_v62 = vpack.c.bf16 %v735_v55, %v731_v53  ;;  %v1803_v63 = vpack.c.bf16 %v742_v57, %v738_v56  ;;  %v737_v0 = vld [vmem:[%s3164_s0 + $0x280] sm:$0xff]  ;;  %v739_v2 = vld [vmem:[%s3164_s0 + $0x290] sm:$0xff]  ;;  %v1867_v3 = vpack.c.bf16 %v744_v59, %v740_v58  ;;  %v746_v5 = vld [vmem:[%s3164_s0 + $0x2c8] sm:$0xff] }
 0x166   : > { %1790 = vmatpush1.bf16.msra.mxu0 %v1789_v23  ;;  %v741_v1 = vld [vmem:[%s3164_s0 + $0x2a0] sm:$0xff]  ;;  %v743_v4 = vld [vmem:[%s3164_s0 + $0x2b0] sm:$0xff]  ;;  %v750_v6 = vld [vmem:[%s3164_s0 + $0x2e8] sm:$0xff] }
 0x167   : > { %1854 = vmatpush1.bf16.msra.mxu1 %v1853_v24  ;;  %1792 = vmatprep.subr.bf16.mxu0 %v1791_v25  ;;  %v748_v7 = vld [vmem:[%s3164_s0 + $0x2d8] sm:$0xff]  ;;  %v1805_v9 = vpack.c.bf16 %v741_v1, %v737_v0  ;;  %v745_v10 = vld [vmem:[%s3164_s0 + $0x2c0] sm:$0xff]  ;;  %v1869_v13 = vpack.c.bf16 %v743_v4, %v739_v2  ;;  %v1807_v14 = vpack.c.bf16 %v750_v6, %v746_v5  ;;  %v747_v15 = vld [vmem:[%s3164_s0 + $0x2d0] sm:$0xff]  ;;  %v643_v4 = vsub.s32 0, %v3282_v61 }
 0x168   : > { %1856 = vmatprep.subr.bf16.mxu1 %v1855_v29  ;;  %v752_v8 = vld [vmem:[%s3164_s0 + $0x2f8] sm:$0xff]  ;;  %v749_v11 = vld [vmem:[%s3164_s0 + $0x2e0] sm:$0xff]  ;;  %v751_v16 = vld [vmem:[%s3164_s0 + $0x2f0] sm:$0xff] }
 0x169   : > { %v754_v17 = vld [vmem:[%s3164_s0 + $0x308] sm:$0xff]  ;;  %v1871_v18 = vpack.c.bf16 %v752_v8, %v748_v7  ;;  %v756_v20 = vld [vmem:[%s3164_s0 + $0x318] sm:$0xff]  ;;  %v1809_v26 = vpack.c.bf16 %v749_v11, %v745_v10  ;;  %v1873_v29 = vpack.c.bf16 %v751_v16, %v747_v15  ;;  %v753_v31 = vld [vmem:[%s3164_s0 + $0x300] sm:$0xff] }
 0x16a   : > { %1794 = vmatpush1.bf16.msra.mxu0 %v1793_v35  ;;  %v758_v19 = vld [vmem:[%s3164_s0 + $0x328] sm:$0xff]  ;;  %v760_v22 = vld [vmem:[%s3164_s0 + $0x338] sm:$0xff]  ;;  %v757_v32 = vld [vmem:[%s3164_s0 + $0x320] sm:$0xff] }
 0x16b   : > { %1858 = vmatpush1.bf16.msra.mxu1 %v1857_v36  ;;  %1796 = vmatprep.subr.bf16.mxu0 %v1795_v37  ;;  %v629_v21 = vld [vmem:[%s480_s5 + $0x8] sm:$0xff]  ;;  %v3304_v23 = vld [vmem:[%s3158_s22] sm:$0x3]  ;;  %v1811_v30 = vpack.c.bf16 %v758_v19, %v754_v17  ;;  %v1875_v34 = vpack.c.bf16 %v760_v22, %v756_v20  ;;  %v1813_v42 = vpack.c.bf16 %v757_v32, %v753_v31 }
 0x16c   : > { %1860 = vmatprep.subr.bf16.mxu1 %v1859_v41  ;;  %v3308_v24 = vld [vmem:[%s480_s5] sm:$0xff]  ;;  %v632_v25 = vmul.f32 %v629_v21, %v629_v21  ;;  %v648_v27 = vrot.slane %v3304_v23, %v647_v12  ;;  %s2639_s5 = smov (!%p1741_p1), 127  }
 0x16d   : > { %v631_v28 = vmul.f32 %v3308_v24, %v3308_v24  ;;  %v755_v33 = vld [vmem:[%s3164_s0 + $0x310] sm:$0xff]  ;;  %v762_v36 = vld [vmem:[%s3164_s0 + $0x348] sm:$0xff]  ;;  %v764_v39 = vld [vmem:[%s3164_s0 + $0x358] sm:$0xff] }
 0x16e   : > { %1798 = vmatpush1.bf16.msra.mxu0 %v1797_v47  ;;  %v759_v35 = vld [vmem:[%s3164_s0 + $0x330] sm:$0xff]  ;;  %v766_v37 = vld [vmem:[%s3164_s0 + $0x368] sm:$0xff]  ;;  %v3319_v38 = vmul.f32 %v648_v27, %v629_v21  ;;  %v768_v40 = vld [vmem:[%s3164_s0 + $0x378] sm:$0xff] }
 0x16f   : > { %1862 = vmatpush1.bf16.msra.mxu1 %v1861_v49  ;;  %1800 = vmatprep.subr.bf16.mxu0 %v1799_v50  ;;  %v633_v41 = vadd.f32 %v632_v25, %v631_v28  ;;  %v1877_v43 = vpack.c.bf16 %v759_v35, %v755_v33  ;;  %v1815_v44 = vpack.c.bf16 %v766_v37, %v762_v36  ;;  %v761_v45 = vld [vmem:[%s3164_s0 + $0x340] sm:$0xff]  ;;  %v763_v47 = vld [vmem:[%s3164_s0 + $0x350] sm:$0xff]  ;;  %v770_v51 = vld [vmem:[%s3164_s0 + $0x388] sm:$0xff] }
 0x170   : > { %1864 = vmatprep.subr.bf16.mxu1 %v1863_v54  ;;  %849 = vmatprep.mubr.f32.mxu0 %v3319_v38  ;;  %v765_v46 = vld [vmem:[%s3164_s0 + $0x360] sm:$0xff]  ;;  %v1879_v49 = vpack.c.bf16 %v768_v40, %v764_v39  ;;  %v767_v50 = vld [vmem:[%s3164_s0 + $0x370] sm:$0xff]  ;;  %v774_v52 = vld [vmem:[%s3164_s0 + $0x3a8] sm:$0xff] }
 0x171   : > { %920 = vmatprep.mubr.f32.mxu1 %v3319_v38  ;;  %v772_v53 = vld [vmem:[%s3164_s0 + $0x398] sm:$0xff]  ;;  %634 = vadd.xlane.f32.xlu0 %v633_v41  ;;  %v1817_v55 = vpack.c.bf16 %v765_v46, %v761_v45  ;;  %v1881_v56 = vpack.c.bf16 %v767_v50, %v763_v47  ;;  %v1819_v57 = vpack.c.bf16 %v774_v52, %v770_v51  ;;  %v769_v58 = vld [vmem:[%s3164_s0 + $0x380] sm:$0xff]  ;;  %v778_v0 = vld [vmem:[%s3164_s0 + $0x3c8] sm:$0xff] }
 0x172   : > { %1802 = vmatpush1.bf16.msra.mxu0 %v1801_v60  ;;  %v776_v54 = vld [vmem:[%s3164_s0 + $0x3b8] sm:$0xff]  ;;  %v773_v59 = vld [vmem:[%s3164_s0 + $0x3a0] sm:$0xff]  ;;  %v771_v60 = vld [vmem:[%s3164_s0 + $0x390] sm:$0xff] }
 0x173   : > { %1866 = vmatpush1.bf16.msra.mxu1 %v1865_v62  ;;  %1804 = vmatprep.subr.bf16.mxu0 %v1803_v63  ;;  %v1883_v62 = vpack.c.bf16 %v776_v54, %v772_v53  ;;  %v775_v63 = vld [vmem:[%s3164_s0 + $0x3b0] sm:$0xff]  ;;  %v782_v1 = vld [vmem:[%s3164_s0 + $0x3e8] sm:$0xff]  ;;  %v780_v2 = vld [vmem:[%s3164_s0 + $0x3d8] sm:$0xff]  ;;  %v1821_v5 = vpack.c.bf16 %v773_v59, %v769_v58 }
 0x174   : > { %1868 = vmatprep.subr.bf16.mxu1 %v1867_v3  ;;  %v784_v3 = vld [vmem:[%s3164_s0 + $0x3f8] sm:$0xff]  ;;  %v1885_v6 = vpack.c.bf16 %v775_v63, %v771_v60  ;;  %v1823_v7 = vpack.c.bf16 %v782_v1, %v778_v0  ;;  %v777_v8 = vld [vmem:[%s3164_s0 + $0x3c0] sm:$0xff]  ;;  %v779_v10 = vld [vmem:[%s3164_s0 + $0x3d0] sm:$0xff] }
 0x175   : > { %v1887_v11 = vpack.c.bf16 %v784_v3, %v780_v2  ;;  %v783_v12 = vld [vmem:[%s3164_s0 + $0x3f0] sm:$0xff]  ;;  %v940_v61 = vld [vmem:[%s3167_s8 + $0x18] sm:$0xff]  ;;  %v1079_v15 = vld [vmem:[%s3177_s9 + $0x8] sm:$0xff] }
 0x176   : > { %1806 = vmatpush1.bf16.msra.mxu0 %v1805_v9  ;;  %v781_v9 = vld [vmem:[%s3164_s0 + $0x3e0] sm:$0xff]  ;;  %v1081_v16 = vld [vmem:[%s3177_s9 + $0x18] sm:$0xff]  ;;  %v939_v21 = vld [vmem:[%s3167_s8 + $0x10] sm:$0xff] }
 0x177   : > { %1870 = vmatpush1.bf16.msra.mxu1 %v1869_v13  ;;  %1808 = vmatprep.subr.bf16.mxu0 %v1807_v14  ;;  %v938_v13 = vld [vmem:[%s3167_s8 + $0x8] sm:$0xff]  ;;  %v644_v14 = vrot.slane %v3304_v23, %v643_v4  ;;  %v1825_v17 = vpack.c.bf16 %v781_v9, %v777_v8  ;;  %v937_v20 = vld [vmem:[%s3167_s8] sm:$0xff]  ;;  %v1955_v25 = vpack.c.bf16 %v1081_v16, %v1079_v15  ;;  %v1080_v23 = vld [vmem:[%s3177_s9 + $0x10] sm:$0xff] }
 0x178   : > { %1872 = vmatprep.subr.bf16.mxu1 %v1871_v18  ;;  %v1889_v18 = vpack.c.bf16 %v783_v12, %v779_v10  ;;  %v1891_v19 = vpack.c.bf16 %v940_v61, %v938_v13  ;;  %v1078_v22 = vld [vmem:[%s3177_s9] sm:$0xff]  ;;  %v944_v27 = vld [vmem:[%s3167_s8 + $0x38] sm:$0xff]  ;;  %v1893_v31 = vpack.c.bf16 %v939_v21, %v937_v20  ;;  %v943_v35 = vld [vmem:[%s3167_s8 + $0x30] sm:$0xff] }
 0x179   : > { %v3358_v28 = vmul.f32 %v644_v14, %v3308_v24  ;;  %v1957_v32 = vpack.c.bf16 %v1080_v23, %v1078_v22  ;;  %v1082_v36 = vld [vmem:[%s3177_s9 + $0x20] sm:$0xff]  ;;  %v1084_v24 = vld [vmem:[%s3177_s9 + $0x30] sm:$0xff]  ;;  %v946_v39 = vld [vmem:[%s3167_s8 + $0x48] sm:$0xff] }
 0x17a   : > { %1810 = vmatpush1.bf16.msra.mxu0 %v1809_v26  ;;  %v942_v26 = vld [vmem:[%s3167_s8 + $0x28] sm:$0xff]  ;;  %v948_v40 = vld [vmem:[%s3167_s8 + $0x58] sm:$0xff]  ;;  %v945_v46 = vld [vmem:[%s3167_s8 + $0x40] sm:$0xff] }
 0x17b   : > { %1874 = vmatpush1.bf16.msra.mxu1 %v1873_v29  ;;  %1812 = vmatprep.subr.bf16.mxu0 %v1811_v30  ;;  %v1083_v29 = vld [vmem:[%s3177_s9 + $0x28] sm:$0xff]  ;;  %v1085_v30 = vld [vmem:[%s3177_s9 + $0x38] sm:$0xff]  ;;  %v1895_v33 = vpack.c.bf16 %v944_v27, %v942_v26  ;;  %v1899_v45 = vpack.c.bf16 %v948_v40, %v946_v39  ;;  %v947_v47 = vld [vmem:[%s3167_s8 + $0x50] sm:$0xff] }
 0x17c   : > { %1876 = vmatprep.subr.bf16.mxu1 %v1875_v34  ;;  %v941_v34 = vld [vmem:[%s3167_s8 + $0x20] sm:$0xff]  ;;  %v1959_v37 = vpack.c.bf16 %v1085_v30, %v1083_v29  ;;  %v1087_v41 = vld [vmem:[%s3177_s9 + $0x48] sm:$0xff]  ;;  %v1088_v51 = vld [vmem:[%s3177_s9 + $0x50] sm:$0xff] }
 0x17d   : > { %v950_v52 = vld [vmem:[%s3167_s8 + $0x68] sm:$0xff]  ;;  %v952_v53 = vld [vmem:[%s3167_s8 + $0x78] sm:$0xff]  ;;  %v949_v59 = vld [vmem:[%s3167_s8 + $0x60] sm:$0xff] }
 0x17e   : > { %1814 = vmatpush1.bf16.msra.mxu0 %v1813_v42  ;;  %v1089_v42 = vld [vmem:[%s3177_s9 + $0x58] sm:$0xff]  ;;  %v1091_v54 = vld [vmem:[%s3177_s9 + $0x68] sm:$0xff]  ;;  %v1903_v58 = vpack.c.bf16 %v952_v53, %v950_v52  ;;  %v951_v60 = vld [vmem:[%s3167_s8 + $0x70] sm:$0xff] }
 0x17f   : > { %1878 = vmatpush1.bf16.msra.mxu1 %v1877_v43  ;;  %1816 = vmatprep.subr.bf16.mxu0 %v1815_v44  ;;  %v1897_v43 = vpack.c.bf16 %v943_v35, %v941_v34  ;;  %v1961_v44 = vpack.c.bf16 %v1084_v24, %v1082_v36  ;;  %v1963_v50 = vpack.c.bf16 %v1089_v42, %v1087_v41  ;;  %v1092_v0 = vld [vmem:[%s3177_s9 + $0x70] sm:$0xff]  ;;  %v954_v1 = vld [vmem:[%s3167_s8 + $0x88] sm:$0xff]  ;;  %v1097_v3 = vld [vmem:[%s3177_s9 + $0x98] sm:$0xff] }
 0x180   : > { %1880 = vmatprep.subr.bf16.mxu1 %v1879_v49  ;;  %v1086_v49 = vld [vmem:[%s3177_s9 + $0x40] sm:$0xff]  ;;  %v1095_v2 = vld [vmem:[%s3177_s9 + $0x88] sm:$0xff]  ;;  %v1905_v4 = vpack.c.bf16 %v951_v60, %v949_v59  ;;  %v955_v8 = vld [vmem:[%s3167_s8 + $0x90] sm:$0xff] }
 0x181   : > { %v1094_v9 = vld [vmem:[%s3177_s9 + $0x80] sm:$0xff]  ;;  %v1971_v10 = vpack.c.bf16 %v1097_v3, %v1095_v2  ;;  %v958_v12 = vld [vmem:[%s3167_s8 + $0xa8] sm:$0xff]  ;;  %v960_v13 = vld [vmem:[%s3167_s8 + $0xb8] sm:$0xff] }
 0x182   : > { %1818 = vmatpush1.bf16.msra.mxu0 %v1817_v55  ;;  %v1093_v55 = vld [vmem:[%s3177_s9 + $0x78] sm:$0xff]  ;;  %v1099_v61 = vld [vmem:[%s3177_s9 + $0xa8] sm:$0xff]  ;;  %v1098_v20 = vld [vmem:[%s3177_s9 + $0xa0] sm:$0xff] }
 0x183   : > { %1882 = vmatpush1.bf16.msra.mxu1 %v1881_v56  ;;  %1820 = vmatprep.subr.bf16.mxu0 %v1819_v57  ;;  %v1901_v56 = vpack.c.bf16 %v947_v47, %v945_v46  ;;  %v1965_v57 = vpack.c.bf16 %v1088_v51, %v1086_v49  ;;  %v1967_v63 = vpack.c.bf16 %v1093_v55, %v1091_v54  ;;  %v1101_v14 = vld [vmem:[%s3177_s9 + $0xb8] sm:$0xff]  ;;  %v1100_v22 = vld [vmem:[%s3177_s9 + $0xb0] sm:$0xff]  ;;  %v1103_v26 = vld [vmem:[%s3177_s9 + $0xc8] sm:$0xff] }
 0x184   : > { %1884 = vmatprep.subr.bf16.mxu1 %v1883_v62  ;;  %v1090_v62 = vld [vmem:[%s3177_s9 + $0x60] sm:$0xff]  ;;  %v1975_v21 = vpack.c.bf16 %v1101_v14, %v1099_v61  ;;  %v964_v23 = vld [vmem:[%s3167_s8 + $0xd8] sm:$0xff]  ;;  %v1977_v30 = vpack.c.bf16 %v1100_v22, %v1098_v20  ;;  %v1104_v36 = vld [vmem:[%s3177_s9 + $0xd0] sm:$0xff] }
 0x185   : > { %v1105_v27 = vld [vmem:[%s3177_s9 + $0xd8] sm:$0xff]  ;;  %v1102_v34 = vld [vmem:[%s3177_s9 + $0xc0] sm:$0xff]  ;;  %v1107_v39 = vld [vmem:[%s3177_s9 + $0xe8] sm:$0xff] }
 0x186   : > { %1822 = vmatpush1.bf16.msra.mxu0 %v1821_v5  ;;  %v1969_v5 = vpack.c.bf16 %v1092_v0, %v1090_v62  ;;  %v1979_v35 = vpack.c.bf16 %v1105_v27, %v1103_v26  ;;  %v968_v24 = vld [vmem:[%s3167_s8 + $0xf8] sm:$0xff]  ;;  %v1981_v42 = vpack.c.bf16 %v1104_v36, %v1102_v34  ;;  %v1106_v46 = vld [vmem:[%s3177_s9 + $0xe0] sm:$0xff]  ;;  %v1108_v49 = vld [vmem:[%s3177_s9 + $0xf0] sm:$0xff] }
 0x187   : > { %1886 = vmatpush1.bf16.msra.mxu1 %v1885_v6  ;;  %1824 = vmatprep.subr.bf16.mxu0 %v1823_v7  ;;  %v953_v7 = vld [vmem:[%s3167_s8 + $0x80] sm:$0xff]  ;;  %v1109_v40 = vld [vmem:[%s3177_s9 + $0xf8] sm:$0xff]  ;;  %v1111_v52 = vld [vmem:[%s3177_s9 + $0x108] sm:$0xff]  ;;  %v1985_v55 = vpack.c.bf16 %v1108_v49, %v1106_v46 }
 0x188   : > { %1888 = vmatprep.subr.bf16.mxu1 %v1887_v11  ;;  %v1096_v11 = vld [vmem:[%s3177_s9 + $0x90] sm:$0xff]  ;;  %v1909_v15 = vpack.c.bf16 %v955_v8, %v953_v7  ;;  %v1983_v47 = vpack.c.bf16 %v1109_v40, %v1107_v39  ;;  %v972_v51 = vld [vmem:[%s3167_s8 + $0x118] sm:$0xff]  ;;  %v1110_v59 = vld [vmem:[%s3177_s9 + $0x100] sm:$0xff] }
 0x189   : > { %v1973_v16 = vpack.c.bf16 %v1096_v11, %v1094_v9  ;;  %v1113_v53 = vld [vmem:[%s3177_s9 + $0x118] sm:$0xff]  ;;  %v1112_v62 = vld [vmem:[%s3177_s9 + $0x110] sm:$0xff]  ;;  %v1114_v7 = vld [vmem:[%s3177_s9 + $0x120] sm:$0xff] }
 0x18a   : > { %1826 = vmatpush1.bf16.msra.mxu0 %v1825_v17  ;;  %v1911_v17 = vpack.c.bf16 %v960_v13, %v958_v12  ;;  %v1987_v60 = vpack.c.bf16 %v1113_v53, %v1111_v52  ;;  %v976_v0 = vld [vmem:[%s3167_s8 + $0x138] sm:$0xff]  ;;  %v1989_v3 = vpack.c.bf16 %v1112_v62, %v1110_v59  ;;  %v1116_v9 = vld [vmem:[%s3177_s9 + $0x130] sm:$0xff]  ;;  %v1119_v12 = vld [vmem:[%s3177_s9 + $0x148] sm:$0xff] }
 0x18b   : > { %1890 = vmatpush1.bf16.msra.mxu1 %v1889_v18  ;;  %1892 = vmatprep.subr.bf16.mxu0 %v1891_v19  ;;  %v957_v18 = vld [vmem:[%s3167_s8 + $0xa0] sm:$0xff]  ;;  %v959_v19 = vld [vmem:[%s3167_s8 + $0xb0] sm:$0xff]  ;;  %v980_v11 = vld [vmem:[%s3167_s8 + $0x158] sm:$0xff]  ;;  %v1993_v14 = vpack.c.bf16 %v1116_v9, %v1114_v7 }
 0x18c   : > { %1956 = vmatprep.subr.bf16.mxu1 %v1955_v25  ;;  %v962_v25 = vld [vmem:[%s3167_s8 + $0xc8] sm:$0xff]  ;;  %v1913_v29 = vpack.c.bf16 %v959_v19, %v957_v18  ;;  %v1121_v13 = vld [vmem:[%s3177_s9 + $0x158] sm:$0xff]  ;;  %v1118_v18 = vld [vmem:[%s3177_s9 + $0x140] sm:$0xff] }
 0x18d   : > { %850 = vmatmul.mubr.f32.vlgmr.msra.gmra.mrb[0].mxu0 %v3358_v28  ;;  %v1995_v19 = vpack.c.bf16 %v1121_v13, %v1119_v12  ;;  %v1120_v20 = vld [vmem:[%s3177_s9 + $0x150] sm:$0xff]  ;;  %v984_v22 = vld [vmem:[%s3167_s8 + $0x178] sm:$0xff] }
 0x18e   : > { %921 = vmatmul.mubr.f32.vlgmr.msra.gmra.mrb[0].mxu1 %v3358_v28  ;;  %1894 = vmatpush1.bf16.msra.mxu0 %v1893_v31  ;;  %v1915_v31 = vpack.c.bf16 %v964_v23, %v962_v25  ;;  %v1123_v25 = vld [vmem:[%s3177_s9 + $0x168] sm:$0xff]  ;;  %v1125_v23 = vld [vmem:[%s3177_s9 + $0x178] sm:$0xff]  ;;  %v1997_v27 = vpack.c.bf16 %v1120_v20, %v1118_v18  ;;  %v1124_v34 = vld [vmem:[%s3177_s9 + $0x170] sm:$0xff] }
 0x18f   : > { %1958 = vmatpush1.bf16.msra.mxu1 %v1957_v32  ;;  %1896 = vmatprep.subr.bf16.mxu0 %v1895_v33  ;;  %v961_v32 = vld [vmem:[%s3167_s8 + $0xc0] sm:$0xff]  ;;  %v963_v33 = vld [vmem:[%s3167_s8 + $0xd0] sm:$0xff]  ;;  %v988_v36 = vld [vmem:[%s3167_s8 + $0x198] sm:$0xff] }
 0x190   : > { %1960 = vmatprep.subr.bf16.mxu1 %v1959_v37  ;;  %1065 = vmatprep.mubr.f32.mxu0 %v3319_v38  ;;  %v966_v37 = vld [vmem:[%s3167_s8 + $0xe8] sm:$0xff]  ;;  %v1917_v41 = vpack.c.bf16 %v963_v33, %v961_v32  ;;  %v1122_v32 = vld [vmem:[%s3177_s9 + $0x160] sm:$0xff]  ;;  %v1999_v33 = vpack.c.bf16 %v1125_v23, %v1123_v25  ;;  %v1128_v46 = vld [vmem:[%s3177_s9 + $0x190] sm:$0xff] }
 0x191   : > { %1206 = vmatprep.mubr.f32.mxu1 %v3319_v38  ;;  %v956_v38 = vld [vmem:[%s3167_s8 + $0x98] sm:$0xff]  ;;  %v2001_v40 = vpack.c.bf16 %v1124_v34, %v1122_v32  ;;  %v1132_v59 = vld [vmem:[%s3177_s9 + $0x1b0] sm:$0xff] }
 0x192   : > { %1898 = vmatpush1.bf16.msra.mxu0 %v1897_v43  ;;  %v1907_v6 = vpack.c.bf16 %v956_v38, %v954_v1  ;;  %v1919_v43 = vpack.c.bf16 %v968_v24, %v966_v37  ;;  %v1115_v1 = vld [vmem:[%s3177_s9 + $0x128] sm:$0xff]  ;;  %v1117_v38 = vld [vmem:[%s3177_s9 + $0x138] sm:$0xff]  ;;  %v1136_v7 = vld [vmem:[%s3177_s9 + $0x1d0] sm:$0xff] }
 0x193   : > { %1962 = vmatpush1.bf16.msra.mxu1 %v1961_v44  ;;  %1900 = vmatprep.subr.bf16.mxu0 %v1899_v45  ;;  %v965_v44 = vld [vmem:[%s3167_s8 + $0xe0] sm:$0xff]  ;;  %v967_v45 = vld [vmem:[%s3167_s8 + $0xf0] sm:$0xff]  ;;  %v1991_v8 = vpack.c.bf16 %v1117_v38, %v1115_v1  ;;  %v1127_v37 = vld [vmem:[%s3177_s9 + $0x188] sm:$0xff] }
 0x194   : > { %1964 = vmatprep.subr.bf16.mxu1 %v1963_v50  ;;  %v970_v50 = vld [vmem:[%s3167_s8 + $0x108] sm:$0xff]  ;;  %v1921_v54 = vpack.c.bf16 %v967_v45, %v965_v44  ;;  %v1129_v24 = vld [vmem:[%s3177_s9 + $0x198] sm:$0xff]  ;;  %v1126_v44 = vld [vmem:[%s3177_s9 + $0x180] sm:$0xff] }
 0x195   : > { %v2003_v45 = vpack.c.bf16 %v1129_v24, %v1127_v37  ;;  %v992_v49 = vld [vmem:[%s3167_s8 + $0x1b8] sm:$0xff]  ;;  %v2005_v53 = vpack.c.bf16 %v1128_v46, %v1126_v44  ;;  %v1140_v18 = vld [vmem:[%s3177_s9 + $0x1f0] sm:$0xff]  ;;  %v1076_v24 = vld [vmem:[#allocation4] sm:$0xff] }
 0x196   : > { %1902 = vmatpush1.bf16.msra.mxu0 %v1901_v56  ;;  %v1923_v56 = vpack.c.bf16 %v972_v51, %v970_v50  ;;  %v1131_v50 = vld [vmem:[%s3177_s9 + $0x1a8] sm:$0xff]  ;;  %v1133_v51 = vld [vmem:[%s3177_s9 + $0x1b8] sm:$0xff] }
 0x197   : > { %1966 = vmatpush1.bf16.msra.mxu1 %v1965_v57  ;;  %1904 = vmatprep.subr.bf16.mxu0 %v1903_v58  ;;  %v969_v57 = vld [vmem:[%s3167_s8 + $0x100] sm:$0xff]  ;;  %v971_v58 = vld [vmem:[%s3167_s8 + $0x110] sm:$0xff]  ;;  %v996_v62 = vld [vmem:[%s3167_s8 + $0x1d8] sm:$0xff] }
 0x198   : > { %1968 = vmatprep.subr.bf16.mxu1 %v1967_v63  ;;  %v974_v63 = vld [vmem:[%s3167_s8 + $0x128] sm:$0xff]  ;;  %v1925_v2 = vpack.c.bf16 %v971_v58, %v969_v57  ;;  %v1130_v57 = vld [vmem:[%s3177_s9 + $0x1a0] sm:$0xff]  ;;  %v2007_v58 = vpack.c.bf16 %v1133_v51, %v1131_v50  ;;  %v1000_v9 = vld [vmem:[%s3167_s8 + $0x1f8] sm:$0xff]  ;;  %v2638_v51 = vmov (!%p1741_p1), 0  }
 0x199   : > { %v2009_v38 = vpack.c.bf16 %v1132_v59, %v1130_v57  ;;  %v653_v23 = vld [vmem:[#allocation2] sm:$0xff]  ;;  %2193 = vset.pattern.permute.xlu0 (!%p1741_p1), %v2638_v51 }
 0x19a   : > { %1906 = vmatpush1.bf16.msra.mxu0 %v1905_v4  ;;  %v1927_v4 = vpack.c.bf16 %v976_v0, %v974_v63  ;;  %v1135_v63 = vld [vmem:[%s3177_s9 + $0x1c8] sm:$0xff]  ;;  %v1137_v0 = vld [vmem:[%s3177_s9 + $0x1d8] sm:$0xff] }
 0x19b   : > { %1970 = vmatpush1.bf16.msra.mxu1 %v1969_v5  ;;  %1908 = vmatprep.subr.bf16.mxu0 %v1907_v6  ;;  %v973_v5 = vld [vmem:[%s3167_s8 + $0x120] sm:$0xff]  ;;  %v975_v6 = vld [vmem:[%s3167_s8 + $0x130] sm:$0xff] }
 0x19c   : > { %1972 = vmatprep.subr.bf16.mxu1 %v1971_v10  ;;  %v978_v10 = vld [vmem:[%s3167_s8 + $0x148] sm:$0xff]  ;;  %v1929_v61 = vpack.c.bf16 %v975_v6, %v973_v5  ;;  %v1134_v5 = vld [vmem:[%s3177_s9 + $0x1c0] sm:$0xff]  ;;  %v2011_v6 = vpack.c.bf16 %v1137_v0, %v1135_v63 }
 0x19d   : > { %v2013_v13 = vpack.c.bf16 %v1136_v7, %v1134_v5 }
 0x19e   : > { %1910 = vmatpush1.bf16.msra.mxu0 %v1909_v15  ;;  %v1931_v15 = vpack.c.bf16 %v980_v11, %v978_v10  ;;  %v1139_v10 = vld [vmem:[%s3177_s9 + $0x1e8] sm:$0xff]  ;;  %v1141_v11 = vld [vmem:[%s3177_s9 + $0x1f8] sm:$0xff] }
 0x19f   : > { %1974 = vmatpush1.bf16.msra.mxu1 %v1973_v16  ;;  %1912 = vmatprep.subr.bf16.mxu0 %v1911_v17  ;;  %v977_v16 = vld [vmem:[%s3167_s8 + $0x140] sm:$0xff]  ;;  %v979_v17 = vld [vmem:[%s3167_s8 + $0x150] sm:$0xff] }
 0x1a0   : > { %1976 = vmatprep.subr.bf16.mxu1 %v1975_v21  ;;  %v982_v21 = vld [vmem:[%s3167_s8 + $0x168] sm:$0xff]  ;;  %v1933_v26 = vpack.c.bf16 %v979_v17, %v977_v16  ;;  %v2015_v16 = vpack.c.bf16 %v1141_v11, %v1139_v10  ;;  %v1138_v17 = vld [vmem:[%s3177_s9 + $0x1e0] sm:$0xff] }
 0x1a1   : > { %v2017_v20 = vpack.c.bf16 %v1140_v18, %v1138_v17 }
 0x1a2   : > { %1914 = vmatpush1.bf16.msra.mxu0 %v1913_v29  ;;  %v1935_v29 = vpack.c.bf16 %v984_v22, %v982_v21  ;;  %v630_v21 = vld [vmem:[#allocation5] sm:$0xff] }
 0x1a3   : > { %1978 = vmatpush1.bf16.msra.mxu1 %v1977_v30  ;;  %1916 = vmatprep.subr.bf16.mxu0 %v1915_v31  ;;  %v981_v30 = vld [vmem:[%s3167_s8 + $0x160] sm:$0xff]  ;;  %v983_v31 = vld [vmem:[%s3167_s8 + $0x170] sm:$0xff] }
 0x1a4   : > { %1980 = vmatprep.subr.bf16.mxu1 %v1979_v35  ;;  %v986_v35 = vld [vmem:[%s3167_s8 + $0x188] sm:$0xff]  ;;  %v1937_v39 = vpack.c.bf16 %v983_v31, %v981_v30 }
 0x1a5   : > { %v656_v30 = vld [vmem:[#allocation2 + $0x18] sm:$0xff] }
 0x1a6   : > { %1918 = vmatpush1.bf16.msra.mxu0 %v1917_v41  ;;  %v1939_v41 = vpack.c.bf16 %v988_v36, %v986_v35 }
 0x1a7   : > { %1982 = vmatpush1.bf16.msra.mxu1 %v1981_v42  ;;  %1920 = vmatprep.subr.bf16.mxu0 %v1919_v43  ;;  %v985_v42 = vld [vmem:[%s3167_s8 + $0x180] sm:$0xff]  ;;  %v987_v43 = vld [vmem:[%s3167_s8 + $0x190] sm:$0xff] }
 0x1a8   : > { %1984 = vmatprep.subr.bf16.mxu1 %v1983_v47  ;;  %v990_v47 = vld [vmem:[%s3167_s8 + $0x1a8] sm:$0xff]  ;;  %v1941_v52 = vpack.c.bf16 %v987_v43, %v985_v42 }
 0x1aa   : > { %1922 = vmatpush1.bf16.msra.mxu0 %v1921_v54  ;;  %v1943_v54 = vpack.c.bf16 %v992_v49, %v990_v47 }
 0x1ab   : > { %1986 = vmatpush1.bf16.msra.mxu1 %v1985_v55  ;;  %1924 = vmatprep.subr.bf16.mxu0 %v1923_v56  ;;  %v989_v55 = vld [vmem:[%s3167_s8 + $0x1a0] sm:$0xff]  ;;  %v991_v56 = vld [vmem:[%s3167_s8 + $0x1b0] sm:$0xff] }
 0x1ac   : > { %1988 = vmatprep.subr.bf16.mxu1 %v1987_v60  ;;  %v994_v60 = vld [vmem:[%s3167_s8 + $0x1c8] sm:$0xff]  ;;  %v1945_v1 = vpack.c.bf16 %v991_v56, %v989_v55 }
 0x1ae   : > { %1926 = vmatpush1.bf16.msra.mxu0 %v1925_v2  ;;  %v1947_v2 = vpack.c.bf16 %v996_v62, %v994_v60 }
 0x1af   : > { %1990 = vmatpush1.bf16.msra.mxu1 %v1989_v3  ;;  %1928 = vmatprep.subr.bf16.mxu0 %v1927_v4  ;;  %v993_v3 = vld [vmem:[%s3167_s8 + $0x1c0] sm:$0xff]  ;;  %v995_v4 = vld [vmem:[%s3167_s8 + $0x1d0] sm:$0xff] }
 0x1b0   : > { %1992 = vmatprep.subr.bf16.mxu1 %v1991_v8  ;;  %v998_v8 = vld [vmem:[%s3167_s8 + $0x1e8] sm:$0xff]  ;;  %v1949_v12 = vpack.c.bf16 %v995_v4, %v993_v3 }
 0x1b2   : > { %1930 = vmatpush1.bf16.msra.mxu0 %v1929_v61  ;;  %v1951_v61 = vpack.c.bf16 %v1000_v9, %v998_v8  ;;  %v1249_v8 = vand.u32 (!%p1741_p1), 127, %v641_v48 }
 0x1b3   : > { %1994 = vmatpush1.bf16.msra.mxu1 %v1993_v14  ;;  %1932 = vmatprep.subr.bf16.mxu0 %v1931_v15  ;;  %v997_v14 = vld [vmem:[%s3167_s8 + $0x1e0] sm:$0xff]  ;;  %v999_v15 = vld [vmem:[%s3167_s8 + $0x1f0] sm:$0xff] }
 0x1b4   : > { %1996 = vmatprep.subr.bf16.mxu1 %v1995_v19  ;;  %v1953_v19 = vpack.c.bf16 %v999_v15, %v997_v14  ;;  %v1268_v9 = vadd.s32 (!%p1741_p1), 128, %v1249_v8  ;;  %vm1263_vm2 = vcmp.lt.s32.totalorder (!%p1741_p1), %v1249_v8, 1  ;;  %vm1250_vm4 = vcmp.lt.s32.totalorder (!%p1741_p1), %v1249_v8, 127 }
 0x1b6   : > { %1934 = vmatpush1.bf16.msra.mxu0 %v1933_v26  ;;  %v655_v26 = vld [vmem:[#allocation2 + $0x10] sm:$0xff] }
 0x1b7   : > { %1998 = vmatpush1.bf16.msra.mxu1 %v1997_v27  ;;  %1936 = vmatprep.subr.bf16.mxu0 %v1935_v29  ;;  %v654_v27 = vld [vmem:[#allocation2 + $0x8] sm:$0xff] }
 0x1b8   : > { %2000 = vmatprep.subr.bf16.mxu1 %v1999_v33 }
 0x1ba   : > { %1938 = vmatpush1.bf16.msra.mxu0 %v1937_v39  ;;  %v936_v39 = vld [vmem:[#allocation3 + $0x8] sm:$0xff] }
 0x1bb   : > { %2002 = vmatpush1.bf16.msra.mxu1 %v2001_v40  ;;  %1940 = vmatprep.subr.bf16.mxu0 %v1939_v41  ;;  %v1077_v41 = vld [vmem:[#allocation4 + $0x8] sm:$0xff] }
 0x1bc   : > { %2004 = vmatprep.subr.bf16.mxu1 %v2003_v45 }
 0x1be   : > { %1942 = vmatpush1.bf16.msra.mxu0 %v1941_v52 }
 0x1bf   : > { %2006 = vmatpush1.bf16.msra.mxu1 %v2005_v53  ;;  %1944 = vmatprep.subr.bf16.mxu0 %v1943_v54 }
 0x1c0   : > { %2008 = vmatprep.subr.bf16.mxu1 %v2007_v58 }
 0x1c2   : > { %1946 = vmatpush1.bf16.msra.mxu0 %v1945_v1 }
 0x1c3   : > { %2010 = vmatpush1.bf16.msra.mxu1 %v2009_v38  ;;  %1948 = vmatprep.subr.bf16.mxu0 %v1947_v2 }
 0x1c4   : > { %2012 = vmatprep.subr.bf16.mxu1 %v2011_v6 }
 0x1c6   : > { %1950 = vmatpush1.bf16.msra.mxu0 %v1949_v12  ;;  %v1282_v12 = vand.u32 (!%p1741_p1), 1, %v1268_v9 }
 0x1c7   : > { %2014 = vmatpush1.bf16.msra.mxu1 %v2013_v13  ;;  %1952 = vmatprep.subr.bf16.mxu0 %v1951_v61  ;;  %v1269_v13 = vadd.s32 (!%p1741_p1), 256, %v1249_v8  ;;  %v1270_v61 = vadd.s32 (!%p1741_p1), 384, %v1249_v8 }
 0x1c8   : > { %2016 = vmatprep.subr.bf16.mxu1 %v2015_v16  ;;  %v1225_v16 = vld [vmem:[%s3180_s16] sm:$0xff] (!%p1741_p1)  ;;  %vm3497_vm3 = vcmp.eq.s32.totalorder (!%p1741_p1), %v1282_v12, 0 }
 0x1c9   : > { %v1289_v18 = vand.u32 (!%p1741_p1), 1, %v1269_v13 }
 0x1ca   : > { %1954 = vmatpush1.bf16.msra.mxu0 %v1953_v19  ;;  %v1275_v19 = vand.u32 (!%p1741_p1), 1, %v1249_v8 }
 0x1cb   : > { %2018 = vmatpush1.bf16.msra.mxu1 %v2017_v20  ;;  %v1296_v20 = vand.u32 (!%p1741_p1), 1, %v1270_v61  ;;  %vm3506_vm5 = vcmp.eq.s32.totalorder (!%p1741_p1), %v1289_v18, 0 }
 0x1cc   : > { %vm3510_vm6 = vcmp.eq.s32.totalorder (!%p1741_p1), %v1275_v19, 0 }
 0x1cd   : > { %1066 = vmatmul.mubr.f32.vlgmr.msra.gmra.mrb[2].mxu0 %v3358_v28  ;;  %vm3514_vm7 = vcmp.eq.s32.totalorder (!%p1741_p1), %v1296_v20, 0 }
 0x1ce   : > { %1207 = vmatmul.mubr.f32.vlgmr.msra.gmra.mrb[2].mxu1 %v3358_v28  ;;  %v935_v28 = vld [vmem:[#allocation3] sm:$0xff] }
 0x1fe   : > { %v635_v22 = vpop.xlane.xlu0 %634 }
 0x1ff   : > { %v636_v25 = vadd.f32 %v635_v22, %v630_v21  ;;  %v1226_v21 = vld [vmem:[%s3188_s19] sm:$0xff] (!%p1741_p1) }
 0x201   : > { %638 = vst.msk [vmem:[#allocation5] sm:$0xff] %vm637_vm1, %v636_v25 }
 0x208   : > { %v1221_v50 = vld [vmem:[#allocation5] sm:$0xff] (!%p1741_p1) }
 0x209   : > { %v1222_v52 = vmul.f32 (!%p1741_p1), 0.001953125, %v1221_v50 }
 0x20b   : > { %v1223_v53 = vadd.f32 (!%p1741_p1), 1e-05, %v1222_v52 }
 0x20d   : > { %2194 = vrsqrt.f32 (!%p1741_p1), %v1223_v53 }
 0x217   : > { %v2195_v54 = vpop.eup (!%p1741_p1), %2194 }
 0x218   : > { %1233 = vperm.xlu0 (!%p1741_p1), %2193, %v2195_v54  }
 0x260   : > { %v851_v29 = vpop.f32.mrb[0].mxu0 }
 0x261   : > { %v927_v31 = vadd.f32 %v851_v29, %v653_v23  ;;  %v922_v32 = vpop.f32.mrb[0].mxu1  ;;  %v853_v33 = vpop.f32.mrb[1].mxu0 }
 0x262   : > { %v929_v34 = vadd.f32 %v922_v32, %v655_v26  ;;  %v928_v35 = vadd.f32 %v853_v33, %v654_v27  ;;  %v924_v36 = vpop.f32.mrb[1].mxu1 }
 0x263   : > { %931 = vst [vmem:[#allocation2] sm:$0xff] %v927_v31  ;;  %v930_v37 = vadd.f32 %v924_v36, %v656_v30 }
 0x264   : > { %933 = vst [vmem:[#allocation2 + $0x10] sm:$0xff] %v929_v34  ;;  %932 = vst [vmem:[#allocation2 + $0x8] sm:$0xff] %v928_v35 }
 0x265   : > { %934 = vst [vmem:[#allocation2 + $0x18] sm:$0xff] %v930_v37 }
 0x26a   : > { %v1227_v58 = vld [vmem:[#allocation2] sm:$0xff] (!%p1741_p1) }
 0x26b   : > { %v1228_v57 = vld [vmem:[#allocation2 + $0x8] sm:$0xff] (!%p1741_p1)  ;;  %v1229_v1 = vld [vmem:[#allocation2 + $0x10] sm:$0xff] (!%p1741_p1) }
 0x26c   : > { %v1230_v38 = vld [vmem:[#allocation2 + $0x18] sm:$0xff] (!%p1741_p1) }
 0x297   : > { %v1234_v59 = vpop.permute.xlu0 (!%p1741_p1), %1233 }
 0x298   : > { %v1237_v63 = vmul.f32 (!%p1741_p1), %v1234_v59, %v1228_v57  ;;  %v1236_v0 = vmul.f32 (!%p1741_p1), %v1234_v59, %v1227_v58  ;;  %v1238_v2 = vmul.f32 (!%p1741_p1), %v1234_v59, %v1229_v1  ;;  %v1239_v3 = vmul.f32 (!%p1741_p1), %v1234_v59, %v1230_v38 }
 0x29a   : > { %1242 = vrot.lane.b32.xlu1 (!%p1741_p1), %v1237_v63, %s2639_s5  ;;  %1240 = vrot.lane.b32.xlu0 (!%p1741_p1), %v1236_v0, %s2639_s5  ;;  %v1328_v26 = vmul.f32 (!%p1741_p1), %v1237_v63, %v1225_v16  ;;  %v1327_v33 = vmul.f32 (!%p1741_p1), %v1236_v0, %v1225_v16 }
 0x29e   : > { %1244 = vrot.lane.b32.xlu1 (!%p1741_p1), %v1238_v2, %s2639_s5  ;;  %1246 = vrot.lane.b32.xlu0 (!%p1741_p1), %v1239_v3, %s2639_s5 }
 0x29f   : > { %1220 = sbr.rel (%p1741_p1) target bundleno = 812 (0x32c), region = 84 }
 0x2a0   : > { %v1067_v40 = vpop.f32.mrb[2].mxu0 }
 0x2a1   : > { %v1072_v42 = vadd.f32 %v1067_v40, %v935_v28  ;;  %v1208_v43 = vpop.f32.mrb[2].mxu1  ;;  %v1069_v44 = vpop.f32.mrb[3].mxu0 }
 0x2a2   : > { %v1213_v45 = vadd.f32 %v1208_v43, %v1076_v24  ;;  %v1073_v46 = vadd.f32 %v1069_v44, %v936_v39  ;;  %v1210_v47 = vpop.f32.mrb[3].mxu1  ;;  %1255 = vrot.lane.b32.xlu1 (!%p1741_p1), %v1236_v0, %s2640_s29  ;;  %1257 = vrot.lane.b32.xlu0 (!%p1741_p1), %v1237_v63, %s2640_s29 }
 0x2a3   : > { %1074 = vst [vmem:[#allocation3] sm:$0xff] %v1072_v42  ;;  %v1214_v49 = vadd.f32 %v1210_v47, %v1077_v41  ;;  %v1329_v42 = vmul.f32 (!%p1741_p1), %v1238_v2, %v1225_v16 }
 0x2a4   : > { %1215 = vst [vmem:[#allocation4] sm:$0xff] %v1213_v45  ;;  %1075 = vst [vmem:[#allocation3 + $0x8] sm:$0xff] %v1073_v46  ;;  %v1330_v46 = vmul.f32 (!%p1741_p1), %v1239_v3, %v1225_v16 }
 0x2a5   : > { %1216 = vst [vmem:[#allocation4 + $0x8] sm:$0xff] %v1214_v49 }
 0x2a6   : > { %1259 = vrot.lane.b32.xlu1 %v1238_v2, %s2640_s29  ;;  %1261 = vrot.lane.b32.xlu0 %v1239_v3, %s2640_s29 }
 0x2aa   : > { %v1339_v5 = vld [vmem:[#allocation3] sm:$0xff] }
 0x2ab   : > { %v1369_v55 = vld [vmem:[#allocation4] sm:$0xff]  ;;  %v1340_v4 = vld [vmem:[#allocation3 + $0x8] sm:$0xff]  ;;  %v3489_v7 = vmul.f32 %v1339_v5, %v1234_v59 }
 0x2ac   : > { %v1370_v56 = vld [vmem:[#allocation4 + $0x8] sm:$0xff]  ;;  %v1371_v60 = vmul.f32 %v1369_v55, %v1234_v59  ;;  %v3487_v6 = vmul.f32 %v1340_v4, %v1234_v59 }
 0x2ad   : > { %v1372_v62 = vmul.f32 %v1370_v56, %v1234_v59  ;;  %1343 = vrot.lane.b32.xlu1 %v3489_v7, %s2639_s5  ;;  %v1357_v38 = vmul.f32 %v3489_v7, %v1225_v16 }
 0x2ae   : > { %1373 = vst [vmem:[%s3194_s14] sm:$0xff] %v1371_v60  ;;  %1345 = vrot.lane.b32.xlu0 %v3487_v6, %s2639_s5  ;;  %v1358_v1 = vmul.f32 %v3487_v6, %v1225_v16 }
 0x2af   : > { %1374 = vst [vmem:[%s3194_s14 + $0x8] sm:$0xff] %v1372_v62 }
 0x2b1   : > { %1349 = vrot.lane.b32.xlu1 %v3489_v7, %s2640_s29 }
 0x2b2   : > { %1351 = vrot.lane.b32.xlu0 %v3487_v6, %s2640_s29 }
 0x30c   : > { %v1243_v10 = vpop.permute.xlu1 %1242  ;;  %v1241_v11 = vpop.permute.xlu0 %1240 }
 0x30d   : > { %v1253_v34 = vsel %vm1250_vm4, %v1241_v11, %v1243_v10 }
 0x310   : > { %v1245_v14 = vpop.permute.xlu1 %1244  ;;  %v1247_v15 = vpop.permute.xlu0 %1246 }
 0x311   : > { %v1252_v25 = vsel %vm1250_vm4, %v1243_v10, %v1245_v14  ;;  %v1251_v35 = vsel %vm1250_vm4, %v1245_v14, %v1247_v15  ;;  %v1254_v36 = vsel %vm1250_vm4, %v1247_v15, %v1241_v11 }
 0x314   : > { %v1256_v48 = vpop.permute.xlu1 %1255  ;;  %v1258_v22 = vpop.permute.xlu0 %1257 }
 0x315   : > { %v1266_v23 = vsel %vm1263_vm2, %v1256_v48, %v1258_v22 }
 0x316   : > { %v1324_v27 = vsel %vm3497_vm3, %v1252_v25, %v1266_v23 }
 0x317   : > { %v1332_v29 = vmul.f32 %v1324_v27, %v1226_v21 }
 0x318   : > { %v1260_v37 = vpop.permute.xlu1 %1259  ;;  %v1262_v28 = vpop.permute.xlu0 %1261 }
 0x319   : > { %v1336_v24 = vadd.f32 %v1332_v29, %v1328_v26  ;;  %v1265_v39 = vsel %vm1263_vm2, %v1258_v22, %v1260_v37  ;;  %v1264_v40 = vsel %vm1263_vm2, %v1260_v37, %v1262_v28  ;;  %v1267_v41 = vsel %vm1263_vm2, %v1262_v28, %v1256_v48 }
 0x31a   : > { %v1325_v43 = vsel %vm3506_vm5, %v1251_v35, %v1265_v39  ;;  %v1323_v44 = vsel %vm3510_vm6, %v1253_v34, %v1267_v41  ;;  %v1326_v45 = vsel %vm3514_vm7, %v1254_v36, %v1264_v40 }
 0x31b   : > { %1364 = vst [vmem:[%s3190_s15 + $0x8] sm:$0xff] %v1336_v24  ;;  %v1333_v47 = vmul.f32 %v1325_v43, %v1226_v21  ;;  %v1331_v49 = vmul.f32 %v1323_v44, %v1226_v21  ;;  %v1334_v50 = vmul.f32 %v1326_v45, %v1226_v21 }
 0x31d   : > { %v1337_v53 = vadd.f32 %v1333_v47, %v1329_v42  ;;  %v1335_v54 = vadd.f32 %v1331_v49, %v1327_v33  ;;  %v1338_v55 = vadd.f32 %v1334_v50, %v1330_v46 }
 0x31f   : > { %v1344_v52 = vpop.permute.xlu1 %1343  ;;  %1365 = vst [vmem:[%s3190_s15 + $0x10] sm:$0xff] %v1337_v53  ;;  %1363 = vst [vmem:[%s3190_s15] sm:$0xff] %v1335_v54 }
 0x320   : > { %v1346_v51 = vpop.permute.xlu0 %1345  ;;  %1366 = vst [vmem:[%s3190_s15 + $0x18] sm:$0xff] %v1338_v55 }
 0x321   : > { %v1347_v58 = vsel %vm1250_vm4, %v1344_v52, %v1346_v51  ;;  %v1348_v59 = vsel %vm1250_vm4, %v1346_v51, %v1344_v52 }
 0x323   : > { %v1350_v57 = vpop.permute.xlu1 %1349 }
 0x324   : > { %v1352_v56 = vpop.permute.xlu0 %1351 }
 0x325   : > { %v1353_v60 = vsel %vm1263_vm2, %v1350_v57, %v1352_v56  ;;  %v1354_v62 = vsel %vm1263_vm2, %v1352_v56, %v1350_v57 }
 0x326   : > { %v1355_v63 = vsel %vm3510_vm6, %v1347_v58, %v1354_v62  ;;  %v1356_v0 = vsel %vm3497_vm3, %v1348_v59, %v1353_v60 }
 0x327   : > { %v1359_v2 = vmul.f32 %v1355_v63, %v1226_v21  ;;  %v1360_v3 = vmul.f32 %v1356_v0, %v1226_v21 }
 0x329   : > { %v1361_v4 = vadd.f32 %v1359_v2, %v1357_v38  ;;  %v1362_v5 = vadd.f32 %v1360_v3, %v1358_v1 }
 0x32b   : > { %1367 = vst [vmem:[%s3192_s23] sm:$0xff] %v1361_v4  ;;  %1368 = vst [vmem:[%s3192_s23 + $0x8] sm:$0xff] %v1362_v5 }
 0x32c PF: > { %s3822_s3 = sld [smem:[#allocation35_spill]]  ;;  %s3823_s12 = sld [smem:[#allocation46_spill]] }
 0x32d   : > { %s3824_s0 = sld [smem:[#allocation56_spill]]  ;;  %s1414_s8 = sshll.u32 %s3192_s23, 4  ;;  %s1415_s8 = int_to_ptr.vmem [resolvable:$true] %s1414_s8 }
 0x32e   : > { %s1381_s18 = scalar_lea.sflag [#allocation20], %s3154_s27  ;;  %s2406_s1 = scalar_lea.vmem %s1415_s8, 256 }
 0x32f   : > { %p2407_p8 = scmp.ne.s32.totalorder %s1415_s8, %s2406_s1  ;;  %s2641_s9 = smov [#allocation19]  }
 0x330   : > { %s2410_s11 = sshll.u32 %s2641_s9, 4  ;;  %s2411_s11 = int_to_ptr.vmem [resolvable:$false] %s2410_s11 }
 0x331   : > { %s2412_s16 = scalar_lea.vmem %s2411_s11, 512  ;;  %p2413_p7 = scmp.lt.s32.totalorder %s1415_s8, %s2411_s11 }
 0x332   : > { %s1761_s22 = sshll.u32 %s3822_s3, 8  ;;  %p3825_p11 = scmp.ne.s32.totalorder %s3823_s12, 0 }
 0x333   : > { %s3552_s17 = scalar_lea.hbm %s3824_s0, %s1761_s22  ;;  %p2414_p4 = scmp.lt.s32.totalorder %s2412_s16, %s2406_s1 }
 0x334   : > { %p2408_p13 = pnand %p2407_p8, %p3825_p11 }
 0x335   : > { %p2415_p5 = por %p2414_p4, %p2413_p7 }
 0x336   : > { %p2409_p9 = pneg %p2408_p13 }
 0x338   : > { %p2416_p12 = pnand %p2415_p5, %p2409_p9 }
 0x33a   : > { %2419 = shalt.err (!%p2416_p12)
}
 0x33b   : > { %s2420_s25 = scalar_lea.hbm %s3552_s17, 256  ;;  %s2424_s23 = scalar_lea.hbm %s3824_s0, 1024 }
 0x33c   : > { %p2421_p6 = scmp.ne.s32.totalorder %s3552_s17, %s2420_s25  ;;  %p2425_p3 = scmp.lt.u32.totalorder %s3552_s17, %s3824_s0 }
 0x33d   : > { %p2426_p10 = scmp.lt.u32.totalorder %s2424_s23, %s2420_s25  ;;  %p2428_p8 = scmp.lt.u32.totalorder %s2420_s25, %s3552_s17 }
 0x33e   : > { %p2422_p0 = pnand %p2421_p6, %p3825_p11 }
 0x33f   : > { %p2427_p1 = por %p2426_p10, %p2425_p3 }
 0x340   : > { %p2423_p2 = pneg %p2422_p0 }
 0x341   : > { %p2429_p13 = por %p2428_p8, %p2427_p1 }
 0x343   : > { %p2430_p9 = pnand %p2429_p13, %p2423_p2 }
 0x345   : > { %2433 = shalt.err (!%p2430_p9)
}
 0x346   : > { %2034 = dma.vmem_to_hbm [thread:$0]  (%p3825_p11), %s1415_s8, 256, %s3552_s17, %s1381_s18  }
 0x347   : > { %s1760_s5 = sshll.u32 %s3822_s3, 9  ;;  %s1400_s29 = sshll.u32 %s3190_s15, 4  ;;  %s1401_s29 = int_to_ptr.vmem [resolvable:$true] %s1400_s29 }
 0x348   : > { %s3826_s1 = sld [smem:[#allocation55_spill]]  ;;  %s1376_s11 = scalar_lea.sflag [#allocation8], %s3174_s2 }
 0x349   : > { %s2434_s16 = scalar_lea.vmem %s1401_s29, 512  ;;  %s2642_s25 = smov [#allocation18]  }
 0x34a   : > { %p2435_p7 = scmp.ne.s32.totalorder %s1401_s29, %s2434_s16  ;;  %s2438_s28 = sshll.u32 %s2642_s25, 4  ;;  %s2439_s28 = int_to_ptr.vmem [resolvable:$false] %s2438_s28 }
 0x34b   : > { %s2440_s19 = scalar_lea.vmem %s2439_s28, 1024  ;;  %p2441_p12 = scmp.lt.s32.totalorder %s1401_s29, %s2439_s28 }
 0x34c   : > { %p2436_p4 = pnand %p2435_p7, %p3825_p11  ;;  %p2442_p6 = scmp.lt.s32.totalorder %s2440_s19, %s2434_s16 }
 0x34e   : > { %s3580_s9 = scalar_lea.hbm %s3826_s1, %s1760_s5  ;;  %p2437_p5 = pneg %p2436_p4 }
 0x34f   : > { %p2443_p0 = por %p2442_p6, %p2441_p12 }
 0x351   : > { %p2444_p2 = pnand %p2443_p0, %p2437_p5 }
 0x353   : > { %2447 = shalt.err (!%p2444_p2)
}
 0x354   : > { %s2448_s2 = scalar_lea.hbm %s3580_s9, 512  ;;  %s2452_s8 = scalar_lea.hbm %s3826_s1, 2048 }
 0x355   : > { %p2449_p3 = scmp.ne.s32.totalorder %s3580_s9, %s2448_s2  ;;  %p2453_p8 = scmp.lt.u32.totalorder %s3580_s9, %s3826_s1 }
 0x356   : > { %p2454_p13 = scmp.lt.u32.totalorder %s2452_s8, %s2448_s2  ;;  %p2456_p7 = scmp.lt.u32.totalorder %s2448_s2, %s3580_s9 }
 0x357   : > { %p2450_p10 = pnand %p2449_p3, %p3825_p11 }
 0x358   : > { %p2455_p9 = por %p2454_p13, %p2453_p8 }
 0x359   : > { %p2451_p1 = pneg %p2450_p10 }
 0x35a   : > { %p2457_p4 = por %p2456_p7, %p2455_p9 }
 0x35c   : > { %p2458_p5 = pnand %p2457_p4, %p2451_p1 }
 0x35e   : > { %2461 = shalt.err (!%p2458_p5)
}
 0x35f   : > { %2033 = dma.vmem_to_hbm [thread:$0]  (%p3825_p11), %s1401_s29, 512, %s3580_s9, %s1376_s11  }
 0x360   : > { %s3827_s20 = sld [smem:[#allocation57_spill]]  ;;  %s1428_s25 = sshll.u32 %s3194_s14, 4  ;;  %s1429_s25 = int_to_ptr.vmem [resolvable:$true] %s1428_s25 }
 0x361   : > { %s2462_s28 = scalar_lea.vmem %s1429_s25, 256  ;;  %s2643_s19 = smov [#allocation21]  }
 0x362   : > { %p2463_p12 = scmp.ne.s32.totalorder %s1429_s25, %s2462_s28  ;;  %s2466_s2 = sshll.u32 %s2643_s19, 4  ;;  %s2467_s2 = int_to_ptr.vmem [resolvable:$false] %s2466_s2 }
 0x363   : > { %s2468_s15 = scalar_lea.vmem %s2467_s2, 512  ;;  %p2469_p2 = scmp.lt.s32.totalorder %s1429_s25, %s2467_s2 }
 0x364   : > { %p2464_p6 = pnand %p2463_p12, %p3825_p11  ;;  %p2470_p3 = scmp.lt.s32.totalorder %s2468_s15, %s2462_s28 }
 0x366   : > { %s3828_s7 = smov %s3827_s20  ;;  %s3605_s16 = scalar_lea.hbm %s3827_s20, %s1761_s22 }
 0x367   : > { %p2465_p0 = pneg %p2464_p6  ;;  %p2471_p10 = por %p2470_p3, %p2469_p2 }
 0x369   : > { %p2472_p1 = pnand %p2471_p10, %p2465_p0 }
 0x36b   : > { %2475 = shalt.err (!%p2472_p1)
}
 0x36c   : > { %s2476_s14 = scalar_lea.hbm %s3605_s16, 256  ;;  %s2480_s29 = scalar_lea.hbm %s3828_s7, 1024 }
 0x36d   : > { %p2477_p8 = scmp.ne.s32.totalorder %s3605_s16, %s2476_s14  ;;  %p2481_p7 = scmp.lt.u32.totalorder %s3605_s16, %s3828_s7 }
 0x36e   : > { %p2482_p4 = scmp.lt.u32.totalorder %s2480_s29, %s2476_s14  ;;  %p2484_p12 = scmp.lt.u32.totalorder %s2476_s14, %s3605_s16 }
 0x36f   : > { %p2478_p13 = pnand %p2477_p8, %p3825_p11 }
 0x370   : > { %p2483_p5 = por %p2482_p4, %p2481_p7 }
 0x371   : > { %p2479_p9 = pneg %p2478_p13 }
 0x372   : > { %p2485_p6 = por %p2484_p12, %p2483_p5 }
 0x374   : > { %p2486_p0 = pnand %p2485_p6, %p2479_p9 }
 0x376   : > { %2489 = shalt.err (!%p2486_p0)
}
 0x377   : > { %2035 = dma.vmem_to_hbm [thread:$0]  (%p3825_p11), %s1429_s25, 256, %s3605_s16, %s1381_s18  }
 0x378 PF: > { %s3829_s17 = sld [smem:[#allocation38_spill]]  ;;  %s3830_s8 = sld [smem:[#allocation28_spill]] }
 0x379   : > { %s3831_s23 = sld [smem:[#allocation48_spill]] }
 0x37e   : > { %p2072_p2 = scmp.ge.s32.totalorder %s3829_s17, 2  ;;  %s1440_s21 = sand.u32 1, %s3830_s8  }
 0x37f   : > { %p3832_p3 = scmp.ne.s32.totalorder %s3831_s23, 0  ;;  %s1441_s30 = scalar_lea.sflag [#allocation8], %s1440_s21 }
 0x381   : > { %p2062_p10 = pnand %p2072_p2, %p3832_p3 }
 0x383   : > { %2563 = dma.done.wait (!%p2062_p10), %s1441_s30, 512  }
 0x384   : > { %2565 = vsyncadd (!%p2062_p10), %s1441_s30, 4294966784  ;;  %s3833_s5 = sadd.s32 4294967294, %s3829_s17  }
 0x385   : > { %s1449_s20 = sand.u32 1, %s3833_s5  }
 0x386   : > { %s1450_s28 = scalar_lea.sflag [#allocation20], %s1449_s20 }
 0x387   : > { %2567 = dma.done.wait (!%p2062_p10), %s1450_s28, 512  }
 0x388   : > { %2569 = vsyncadd (!%p2062_p10), %s1450_s28, 4294966784  ;;  %s38_s22 = sadd.s32 1, %s3829_s17   ;;  %s3835_s12 = sld [smem:[#allocation29_spill]] }
 0x389   : > { %p3634_p11 = scmp.ge.s32.totalorder %s38_s22, 10   ;;  %s3836_s11 = sld [smem:[#allocation47_spill]] }
 0x38a   : > { %s3837_s18 = sld [smem:[#allocation30_spill]]  ;;  %s3838_s14 = sld [smem:[#allocation40_spill]] }
 0x38b   : > { %s3839_s15 = sld [smem:[#allocation32_spill]]  ;;  %s3840_s16 = sld [smem:[#allocation33_spill]] }
 0x38c   : > { %s3841_s17 = sld [smem:[#allocation49_spill]]  ;;  %s3842_s25 = sld [smem:[#allocation36_spill]] }
 0x38d   : > { %s3843_s19 = sld [smem:[#allocation37_spill]]  ;;  %s3844_s20 = sld [smem:[#allocation39_spill]] }
 0x38e   : > { %s3845_s21 = sld [smem:[#allocation44_spill]]  ;;  %s3846_s30 = smov %s2576_s10 }
 0x38f   : > { %s3847_s10 = smov %s3835_s12  ;;  %s3848_s12 = smov %s2588_s13 }
 0x390   : > { %s3849_s13 = smov %s3837_s18  ;;  %37 = sbr.rel (!%p3634_p11) target bundleno = 27 (0x1b), region = 205 }
 0x392   : > { %s3850_s18 = smov %s3842_s25 }
 0x397   :  { %1464 = vsyncpa [#allocation7], 1 }
 0x398   :  { %1466 = vsyncpa [#allocation7 + $0x1], 1 }
 0x399   :  { %1467 = vsyncpa [#allocation10], 1 }
 0x39a   :  { %1469 = vsyncpa [#allocation10 + $0x1], 1 }
 0x39b   :  { %1470 = vsyncpa [#allocation13], 1 }
 0x39c   :  { %1472 = vsyncpa [#allocation13 + $0x1], 1 }
 0x39d   :  { %1473 = vsyncpa [#allocation16], 1 }
 0x39e   :  { %1475 = vsyncpa [#allocation16 + $0x1], 1 }
 0x39f   :  { %1476 = vsyncpa [#allocation8], 1 }
 0x3a0   :  { %1478 = vsyncpa [#allocation8 + $0x1], 1 }
 0x3a1   :  { %1479 = vsyncpa [#allocation20], 1 }
 0x3a2   :  { %1481 = vsyncpa [#allocation20 + $0x1], 1 }

</bundles_post_ra>
